<compile_context>
chip_gen: v6e
topology: v6e:2x2x1
jax: 0.10.0
libtpu: 0.0.40
codegen_flags: <defaults>
</compile_context>

<pallas_src>
import functools
import math

import jax
import jax.numpy as jnp
from jax import lax
from jax.experimental import pallas as pl
from jax.experimental.pallas import tpu as pltpu

PAD = 0            # padding token id
NEG_INF = -1e9
LN_EPS = 1e-5


def _round_up(x, m):
    return ((x + m - 1) // m) * m


_VMEM_LIMIT_CACHE = None


def _vmem_limit():
    """min(96 MiB, 3/4 of physical VMEM): big tiles on v5e/v6e, safe on v7x."""
    global _VMEM_LIMIT_CACHE
    if _VMEM_LIMIT_CACHE is None:
        cap = 64 * 1024 * 1024
        try:
            info = pltpu.get_tpu_info()
            cap = int(getattr(info, "vmem_capacity_bytes", cap) or cap)
        except Exception:
            pass
        _VMEM_LIMIT_CACHE = int(min(96 * 1024 * 1024, (cap * 3) // 4))
    return _VMEM_LIMIT_CACHE


def _seq_tile(s, cap):
    if s <= cap:
        return s
    t = cap
    while t > 8 and s % t:
        t //= 2
    return t if s % t == 0 else s


# ----------------------------- Pallas kernels ------------------------------ #

def _matmul_kernel(x_ref, w_ref, o_ref, acc_ref, *, activation):
    @pl.when(pl.program_id(2) == 0)
    def _init():
        acc_ref[...] = jnp.zeros_like(acc_ref)

    acc_ref[...] += jnp.dot(x_ref[...], w_ref[...],
                            preferred_element_type=jnp.float32)

    @pl.when(pl.program_id(2) == pl.num_programs(2) - 1)
    def _fin():
        r = acc_ref[...]
        if activation == "relu":
            r = jnp.maximum(r, 0.0)
        o_ref[...] = r.astype(o_ref.dtype)


def _matmul_bias_kernel(x_ref, w_ref, b_ref, o_ref, acc_ref, *, activation):
    @pl.when(pl.program_id(2) == 0)
    def _init():
        acc_ref[...] = jnp.zeros_like(acc_ref)

    acc_ref[...] += jnp.dot(x_ref[...], w_ref[...],
                            preferred_element_type=jnp.float32)

    @pl.when(pl.program_id(2) == pl.num_programs(2) - 1)
    def _fin():
        r = acc_ref[...] + b_ref[...]
        if activation == "relu":
            r = jnp.maximum(r, 0.0)
        o_ref[...] = r.astype(o_ref.dtype)


def _linear_add_ln_kernel(x_ref, w_ref, b_ref, res_ref, g_ref, bln_ref,
                          o_ref, acc_ref):
    # o = LayerNorm(res + x @ w + b) ; grid = (M tiles, K tiles)
    k = pl.program_id(1)

    @pl.when(k == 0)
    def _init():
        acc_ref[...] = jnp.zeros_like(acc_ref)

    acc_ref[...] += jnp.dot(x_ref[...], w_ref[...],
                            preferred_element_type=jnp.float32)

    @pl.when(k == pl.num_programs(1) - 1)
    def _fin():
        y = acc_ref[...] + b_ref[...] + res_ref[...].astype(jnp.float32)
        mu = jnp.mean(y, axis=-1, keepdims=True)
        yc = y - mu
        var = jnp.mean(yc * yc, axis=-1, keepdims=True)
        y = yc * lax.rsqrt(var + LN_EPS) * g_ref[...] + bln_ref[...]
        o_ref[...] = y.astype(o_ref.dtype)


def _ffn_add_ln_kernel(x_ref, w1_ref, b1_ref, w2_ref, b2_ref, g_ref, bln_ref,
                       o_ref, acc_ref):
    # o = LayerNorm(x + relu(x @ w1 + b1) @ w2 + b2) ; grid = (M tiles, F tiles)
    f = pl.program_id(1)

    @pl.when(f == 0)
    def _init():
        acc_ref[...] = jnp.zeros_like(acc_ref)

    h = jnp.dot(x_ref[...], w1_ref[...],
                preferred_element_type=jnp.float32) + b1_ref[...]
    h = jnp.maximum(h, 0.0).astype(w2_ref.dtype)
    acc_ref[...] += jnp.dot(h, w2_ref[...], preferred_element_type=jnp.float32)

    @pl.when(f == pl.num_programs(1) - 1)
    def _fin():
        y = acc_ref[...] + b2_ref[...] + x_ref[...].astype(jnp.float32)
        mu = jnp.mean(y, axis=-1, keepdims=True)
        yc = y - mu
        var = jnp.mean(yc * yc, axis=-1, keepdims=True)
        y = yc * lax.rsqrt(var + LN_EPS) * g_ref[...] + bln_ref[...]
        o_ref[...] = y.astype(o_ref.dtype)


def _flash_mha_kernel(q_ref, k_ref, v_ref, kb_ref, o_ref,
                      m_sc, l_sc, acc_sc, *, causal):
    # one (batch, head, q-tile, kv-tile) step; online softmax over kv tiles.
    tq, _ = q_ref.shape
    tk = k_ref.shape[0]
    qi = pl.program_id(2)
    ki = pl.program_id(3)

    @pl.when(ki == 0)
    def _init():
        m_sc[...] = jnp.full_like(m_sc, -1e30)
        l_sc[...] = jnp.zeros_like(l_sc)
        acc_sc[...] = jnp.zeros_like(acc_sc)

    # scores: contract the dh axis directly (no k transpose); the 1/sqrt(dh)
    # scale is folded into the Q projection weights at init.
    s = lax.dot_general(q_ref[...], k_ref[...], (((1,), (1,)), ((), ())),
                        preferred_element_type=jnp.float32)
    s = s + kb_ref[...]                                   # (1, tk) pad bias
    if causal:
        row = qi * tq + lax.broadcasted_iota(jnp.int32, (tq, tk), 0)
        col = ki * tk + lax.broadcasted_iota(jnp.int32, (tq, tk), 1)
        s = jnp.where(col <= row, s, NEG_INF)

    m_prev = m_sc[...]
    m_new = jnp.maximum(m_prev, jnp.max(s, axis=-1, keepdims=True))
    alpha = jnp.exp(m_prev - m_new)
    p = jnp.exp(s - m_new)
    l_sc[...] = alpha * l_sc[...] + jnp.sum(p, axis=-1, keepdims=True)
    acc_sc[...] = alpha * acc_sc[...] + jnp.dot(p.astype(v_ref.dtype), v_ref[...],
                                                preferred_element_type=jnp.float32)
    m_sc[...] = m_new

    @pl.when(ki == pl.num_programs(3) - 1)
    def _fin():
        o_ref[...] = (acc_sc[...] * pl.reciprocal(l_sc[...], approx=True)
                      ).astype(o_ref.dtype)


# --------------------------- Pallas call wrappers --------------------------- #

def pallas_matmul(x, w, b=None, activation=None, out_dtype=jnp.bfloat16,
                  bm=512, bn=512, bk=512):
    """Tiled o = act(x @ w [+ b]).  x:(M,K), w:(K,N) bf16; b:(1,N) f32.
    Weights are expected pre-padded at init; runtime padding only triggers
    when a dim is actually tiled and doesn't divide."""
    M, K = x.shape
    N = w.shape[1]
    tm = M if M <= bm else bm
    tk = K if K <= bk else bk
    tn = N if N <= bn else bn
    Mp, Kp, Np = _round_up(M, tm), _round_up(K, tk), _round_up(N, tn)

    if (Mp, Kp) != (M, K):
        x = jnp.pad(x, ((0, Mp - M), (0, Kp - K)))
    if (Kp, Np) != (K, N):
        w = jnp.pad(w, ((0, Kp - K), (0, Np - N)))

    grid = (Mp // tm, Np // tn, Kp // tk)
    x_spec = pl.BlockSpec((tm, tk), lambda i, j, k: (i, k))
    w_spec = pl.BlockSpec((tk, tn), lambda i, j, k: (k, j))
    o_spec = pl.BlockSpec((tm, tn), lambda i, j, k: (i, j))

    b_bytes = 0
    if b is not None:
        if Np != N:
            b = jnp.pad(b, ((0, 0), (0, Np - N)))
        b_bytes = b.nbytes
        kern = functools.partial(_matmul_bias_kernel, activation=activation)
        in_specs = [x_spec, w_spec, pl.BlockSpec((1, tn), lambda i, j, k: (0, j))]
        args = (x, w, b)
    else:
        kern = functools.partial(_matmul_kernel, activation=activation)
        in_specs = [x_spec, w_spec]
        args = (x, w)

    cost = pl.CostEstimate(
        flops=2 * Mp * Kp * Np, transcendentals=0,
        bytes_accessed=int(x.nbytes + w.nbytes + b_bytes
                           + Mp * Np * jnp.dtype(out_dtype).itemsize))

    out = pl.pallas_call(
        kern,
        out_shape=jax.ShapeDtypeStruct((Mp, Np), out_dtype),
        grid=grid,
        in_specs=in_specs,
        out_specs=o_spec,
        scratch_shapes=[pltpu.VMEM((tm, tn), jnp.float32)],
        compiler_params=pltpu.CompilerParams(
            dimension_semantics=("parallel", "parallel", "arbitrary"),
            vmem_limit_bytes=_vmem_limit()),
        cost_estimate=cost,
    )(*args)
    if (Mp, Np) != (M, N):
        out = out[:M, :N]
    return out


def pallas_linear_add_ln(x, w, b, res, gamma, beta, out_dtype=jnp.bfloat16,
                         bm=256, bk=512):
    """LayerNorm(res + x @ w + b), fused; output keeps the full model dim."""
    M, K = x.shape
    D = w.shape[1]
    if D >= 2048:           # v7x (64 MiB VMEM): keep (tk, D) weight panels small
        bk = 256
    tm = M if M <= bm else bm
    tk = K if K <= bk else bk
    Mp, Kp = _round_up(M, tm), _round_up(K, tk)
    if Mp != M:
        x = jnp.pad(x, ((0, Mp - M), (0, 0)))
        res = jnp.pad(res, ((0, Mp - M), (0, 0)))
    if Kp != K:
        x = jnp.pad(x, ((0, 0), (0, Kp - K)))
        w = jnp.pad(w, ((0, Kp - K), (0, 0)))

    grid = (Mp // tm, Kp // tk)
    cost = pl.CostEstimate(
        flops=2 * Mp * Kp * D + 8 * Mp * D, transcendentals=Mp,
        bytes_accessed=int(x.nbytes + w.nbytes + res.nbytes
                           + Mp * D * jnp.dtype(out_dtype).itemsize))
    out = pl.pallas_call(
        _linear_add_ln_kernel,
        out_shape=jax.ShapeDtypeStruct((Mp, D), out_dtype),
        grid=grid,
        in_specs=[pl.BlockSpec((tm, tk), lambda i, k: (i, k)),
                  pl.BlockSpec((tk, D), lambda i, k: (k, 0)),
                  pl.BlockSpec((1, D), lambda i, k: (0, 0)),
                  pl.BlockSpec((tm, D), lambda i, k: (i, 0)),
                  pl.BlockSpec((1, D), lambda i, k: (0, 0)),
                  pl.BlockSpec((1, D), lambda i, k: (0, 0))],
        out_specs=pl.BlockSpec((tm, D), lambda i, k: (i, 0)),
        scratch_shapes=[pltpu.VMEM((tm, D), jnp.float32)],
        compiler_params=pltpu.CompilerParams(
            dimension_semantics=("parallel", "arbitrary"),
            vmem_limit_bytes=_vmem_limit()),
        cost_estimate=cost,
    )(x, w, b, res, gamma, beta)
    return out[:M] if Mp != M else out


def pallas_ffn_add_ln(x, w1, b1, w2, b2, gamma, beta, out_dtype=jnp.bfloat16,
                      bm=256, bf=512):
    """LayerNorm(x + relu(x @ w1 + b1) @ w2 + b2), fused; hidden tiled over F,
    never materialized in HBM."""
    M, D = x.shape
    F = w1.shape[1]
    if D >= 2048:           # v7x VMEM budget for (D, tf)/(tf, D) weight panels
        bf = 256
    tm = M if M <= bm else bm
    tf = F if F <= bf else bf
    Mp, Fp = _round_up(M, tm), _round_up(F, tf)
    if Mp != M:
        x = jnp.pad(x, ((0, Mp - M), (0, 0)))
    if Fp != F:
        w1 = jnp.pad(w1, ((0, 0), (0, Fp - F)))
        b1 = jnp.pad(b1, ((0, 0), (0, Fp - F)))
        w2 = jnp.pad(w2, ((0, Fp - F), (0, 0)))

    grid = (Mp // tm, Fp // tf)
    cost = pl.CostEstimate(
        flops=4 * Mp * D * Fp + 8 * Mp * D, transcendentals=Mp,
        bytes_accessed=int(x.nbytes + w1.nbytes + w2.nbytes
                           + Mp * D * jnp.dtype(out_dtype).itemsize))
    out = pl.pallas_call(
        _ffn_add_ln_kernel,
        out_shape=jax.ShapeDtypeStruct((Mp, D), out_dtype),
        grid=grid,
        in_specs=[pl.BlockSpec((tm, D), lambda i, f: (i, 0)),
                  pl.BlockSpec((D, tf), lambda i, f: (0, f)),
                  pl.BlockSpec((1, tf), lambda i, f: (0, f)),
                  pl.BlockSpec((tf, D), lambda i, f: (f, 0)),
                  pl.BlockSpec((1, D), lambda i, f: (0, 0)),
                  pl.BlockSpec((1, D), lambda i, f: (0, 0)),
                  pl.BlockSpec((1, D), lambda i, f: (0, 0))],
        out_specs=pl.BlockSpec((tm, D), lambda i, f: (i, 0)),
        scratch_shapes=[pltpu.VMEM((tm, D), jnp.float32)],
        compiler_params=pltpu.CompilerParams(
            dimension_semantics=("parallel", "arbitrary"),
            vmem_limit_bytes=_vmem_limit()),
        cost_estimate=cost,
    )(x, w1, b1, w2, b2, gamma, beta)
    return out[:M] if Mp != M else out


def pallas_mha(q_arr, iq, kv_arr, ik, iv, key_bias, causal,
               out_dtype=jnp.bfloat16):
    """Flash-style multi-head attention.

    q_arr : (Gq, B, H, Sq, dh) head-major packed array; slot `iq` holds Q.
    kv_arr: (Gk, B, H, Skv, dh) head-major packed array; slots `ik`/`iv` hold K/V.
    key_bias: (B, 1, Skv) f32 additive key-padding bias.
    Returns (B, H, Sq, dh).
    """
    _, B, H, Sq, dh = q_arr.shape
    Skv = kv_arr.shape[3]
    tq = _seq_tile(Sq, 256)
    tk = _seq_tile(Skv, 512)
    grid = (B, H, Sq // tq, Skv // tk)

    q_spec = pl.BlockSpec((None, None, None, tq, dh),
                          lambda b, h, qi, ki, s=iq: (s, b, h, qi, 0))
    k_spec = pl.BlockSpec((None, None, None, tk, dh),
                          lambda b, h, qi, ki, s=ik: (s, b, h, ki, 0))
    v_spec = pl.BlockSpec((None, None, None, tk, dh),
                          lambda b, h, qi, ki, s=iv: (s, b, h, ki, 0))
    kb_spec = pl.BlockSpec((None, 1, tk), lambda b, h, qi, ki: (b, 0, ki))
    o_spec = pl.BlockSpec((None, None, tq, dh), lambda b, h, qi, ki: (b, h, qi, 0))

    itemsize = jnp.dtype(q_arr.dtype).itemsize
    cost = pl.CostEstimate(
        flops=4 * B * H * Sq * Skv * dh,
        transcendentals=B * H * Sq * Skv,
        bytes_accessed=int(itemsize * B * H * dh * (2 * Sq + 2 * Skv)
                           + key_bias.nbytes))

    kern = functools.partial(_flash_mha_kernel, causal=causal)
    return pl.pallas_call(
        kern,
        out_shape=jax.ShapeDtypeStruct((B, H, Sq, dh), out_dtype),
        grid=grid,
        in_specs=[q_spec, k_spec, v_spec, kb_spec],
        out_specs=o_spec,
        scratch_shapes=[pltpu.VMEM((tq, 1), jnp.float32),
                        pltpu.VMEM((tq, 1), jnp.float32),
                        pltpu.VMEM((tq, dh), jnp.float32)],
        compiler_params=pltpu.CompilerParams(
            dimension_semantics=("parallel", "parallel", "parallel", "arbitrary"),
            vmem_limit_bytes=_vmem_limit()),
        cost_estimate=cost,
    )(q_arr, kv_arr, kv_arr, key_bias)


# ------------------------------ model pieces ------------------------------- #

def sinusoidal_pe(seq_len, d_model):
    pos = jnp.arange(seq_len, dtype=jnp.float32)[:, None]
    i = jnp.arange(d_model, dtype=jnp.float32)[None, :]
    angle = pos / jnp.power(10000.0, (2.0 * jnp.floor(i / 2.0)) / d_model)
    pe = jnp.where(jnp.mod(jnp.arange(d_model), 2) == 0, jnp.sin(angle), jnp.cos(angle))
    return pe.astype(jnp.float32)


def _heads_5d(x2d, B, S, groups, n_head, dh):
    """(B*S, groups*n_head*dh) -> (groups, B, H, S, dh) head-major (one copy)."""
    return x2d.reshape(B, S, groups, n_head, dh).transpose(2, 0, 3, 1, 4)


def _merge_heads(x, B, S, D):
    """(B, H, S, dh) -> (B*S, D)."""
    return x.transpose(0, 2, 1, 3).reshape(B * S, D)


def encoder_layer(p, x2d, B, S, key_bias, n_head):
    D = x2d.shape[1]
    dh = D // n_head
    qkv = pallas_matmul(x2d, p["self"]["wqkv"], p["self"]["bqkv"])    # (B*S, 3D)
    qkv5 = _heads_5d(qkv, B, S, 3, n_head, dh)                        # (3,B,H,S,dh)
    attn = pallas_mha(qkv5, 0, qkv5, 1, 2, key_bias, causal=False)
    x2d = pallas_linear_add_ln(_merge_heads(attn, B, S, D), p["self"]["wo"],
                               p["self"]["bo"], x2d, p["ln1_g"], p["ln1_b"])
    x2d = pallas_ffn_add_ln(x2d, p["w1"], p["b1"], p["w2"], p["b2"],
                            p["ln2_g"], p["ln2_b"])
    return x2d


def decoder_layer(p, y2d, enc2d, B, T, S, enc_key_bias, dec_key_bias, n_head):
    D = y2d.shape[1]
    dh = D // n_head

    # masked (causal) self-attention, fused QKV
    qkv = pallas_matmul(y2d, p["self"]["wqkv"], p["self"]["bqkv"])    # (B*T, 3D)
    qkv5 = _heads_5d(qkv, B, T, 3, n_head, dh)
    sa = pallas_mha(qkv5, 0, qkv5, 1, 2, dec_key_bias, causal=True)
    y2d = pallas_linear_add_ln(_merge_heads(sa, B, T, D), p["self"]["wo"],
                               p["self"]["bo"], y2d, p["ln1_g"], p["ln1_b"])

    # cross-attention, fused KV projection on encoder output
    q = pallas_matmul(y2d, p["cross"]["wq"], p["cross"]["bq"])        # (B*T, D)
    q5 = _heads_5d(q, B, T, 1, n_head, dh)                            # (1,B,H,T,dh)
    kv = pallas_matmul(enc2d, p["cross"]["wkv"], p["cross"]["bkv"])   # (B*S, 2D)
    kv5 = _heads_5d(kv, B, S, 2, n_head, dh)                          # (2,B,H,S,dh)
    ca = pallas_mha(q5, 0, kv5, 0, 1, enc_key_bias, causal=False)
    y2d = pallas_linear_add_ln(_merge_heads(ca, B, T, D), p["cross"]["wo"],
                               p["cross"]["bo"], y2d, p["ln2_g"], p["ln2_b"])

    y2d = pallas_ffn_add_ln(y2d, p["w1"], p["b1"], p["w2"], p["b2"],
                            p["ln3_g"], p["ln3_b"])
    return y2d


def transformer_forward(params, src_ids, tgt_ids, n_head, tgt_vocab_size):
    B, S = src_ids.shape
    T = tgt_ids.shape[1]
    D = params["enc_emb"].shape[1]

    # tiny per-batch key-padding additive biases; causal mask built in-kernel
    src_key_bias = jnp.where(src_ids == PAD, NEG_INF, 0.0).astype(jnp.float32)[:, None, :]
    tgt_key_bias = jnp.where(tgt_ids == PAD, NEG_INF, 0.0).astype(jnp.float32)[:, None, :]

    x = (params["enc_emb"][src_ids] + params["enc_pe"][None, :S, :]
         ).astype(jnp.bfloat16).reshape(B * S, D)
    for lp in params["enc_layers"]:
        x = encoder_layer(lp, x, B, S, src_key_bias, n_head)

    y = (params["dec_emb"][tgt_ids] + params["dec_pe"][None, :T, :]
         ).astype(jnp.bfloat16).reshape(B * T, D)
    for lp in params["dec_layers"]:
        y = decoder_layer(lp, y, x, B, T, S, src_key_bias, tgt_key_bias, n_head)

    # bias-less output projection; out_w is pre-padded to a lane-dense vocab
    # width at init, the padding is sliced off once here.
    logits = pallas_matmul(y, params["out_w"], b=None, out_dtype=jnp.float32)
    return logits[:, :tgt_vocab_size].reshape(B, T, tgt_vocab_size)


# ------------------------------ initialization ------------------------------ #

def _init_self_mha(key, d_model, n_head):
    # 1/sqrt(dh) softmax scale folded into the Q projection weights/bias.
    scale = 1.0 / math.sqrt(d_model // n_head)
    k1, k2 = jax.random.split(key)
    wqkv = 0.02 * jax.random.normal(k1, (d_model, 3 * d_model))
    wqkv = wqkv.at[:, :d_model].multiply(scale)
    bqkv = jnp.zeros((1, 3 * d_model), jnp.float32).at[:, :d_model].multiply(scale)
    return {
        "wqkv": wqkv.astype(jnp.bfloat16),
        "bqkv": bqkv,
        "wo": (0.02 * jax.random.normal(k2, (d_model, d_model))).astype(jnp.bfloat16),
        "bo": jnp.zeros((1, d_model), jnp.float32),
    }


def _init_cross_mha(key, d_model, n_head):
    scale = 1.0 / math.sqrt(d_model // n_head)
    k1, k2, k3 = jax.random.split(key, 3)
    wq = 0.02 * jax.random.normal(k1, (d_model, d_model)) * scale
    return {
        "wq": wq.astype(jnp.bfloat16),
        "bq": jnp.zeros((1, d_model), jnp.float32),
        "wkv": (0.02 * jax.random.normal(k2, (d_model, 2 * d_model))).astype(jnp.bfloat16),
        "bkv": jnp.zeros((1, 2 * d_model), jnp.float32),
        "wo": (0.02 * jax.random.normal(k3, (d_model, d_model))).astype(jnp.bfloat16),
        "bo": jnp.zeros((1, d_model), jnp.float32),
    }


def _init_ffn_ln(key, d_model, d_ff, n_ln):
    k1, k2 = jax.random.split(key)
    out = {
        "w1": (0.02 * jax.random.normal(k1, (d_model, d_ff))).astype(jnp.bfloat16),
        "b1": jnp.zeros((1, d_ff), jnp.float32),
        "w2": (0.02 * jax.random.normal(k2, (d_ff, d_model))).astype(jnp.bfloat16),
        "b2": jnp.zeros((1, d_model), jnp.float32),
    }
    for i in range(1, n_ln + 1):
        out[f"ln{i}_g"] = jnp.ones((1, d_model), jnp.float32)
        out[f"ln{i}_b"] = jnp.zeros((1, d_model), jnp.float32)
    return out


def init_params(key, src_vocab_size, tgt_vocab_size, src_seq_len, tgt_seq_len,
                d_model, n_head, n_layer):
    d_ff = 4 * d_model
    keys = jax.random.split(key, 3 + 2 * n_layer * 2)

    # pre-pad the output projection to a multiple of 128 once, at init
    vocab_pad = _round_up(tgt_vocab_size, 128)
    out_w = 0.02 * jax.random.normal(keys[2], (d_model, tgt_vocab_size))
    out_w = jnp.pad(out_w, ((0, 0), (0, vocab_pad - tgt_vocab_size))).astype(jnp.bfloat16)

    params = {
        "enc_emb": (0.02 * jax.random.normal(keys[0], (src_vocab_size, d_model))).astype(jnp.float32),
        "dec_emb": (0.02 * jax.random.normal(keys[1], (tgt_vocab_size, d_model))).astype(jnp.float32),
        "out_w": out_w,
        "enc_pe": sinusoidal_pe(src_seq_len, d_model),
        "dec_pe": sinusoidal_pe(tgt_seq_len, d_model),
        "enc_layers": [],
        "dec_layers": [],
    }
    ki = 3
    for _ in range(n_layer):
        lp = {"self": _init_self_mha(keys[ki], d_model, n_head)}
        lp.update(_init_ffn_ln(keys[ki + 1], d_model, d_ff, n_ln=2))
        params["enc_layers"].append(lp)
        ki += 2
    for _ in range(n_layer):
        lp = {"self": _init_self_mha(keys[ki], d_model, n_head),
              "cross": _init_cross_mha(jax.random.fold_in(keys[ki], 7), d_model, n_head)}
        lp.update(_init_ffn_ln(keys[ki + 1], d_model, d_ff, n_ln=3))
        params["dec_layers"].append(lp)
        ki += 2
    return params


# ----------------------------------- main ----------------------------------- #

if __name__ == "__main__":
    batch = 2
    src_seq_len = 8
    tgt_seq_len = 8
    d_model = 32
    n_head = 4
    n_layer = 2
    src_vocab_size = 40
    tgt_vocab_size = 48

    key = jax.random.PRNGKey(0)
    kp, ks, kt = jax.random.split(key, 3)

    params = init_params(kp, src_vocab_size, tgt_vocab_size, src_seq_len, tgt_seq_len,
                         d_model, n_head, n_layer)

    # deterministic example inputs; trailing PAD tokens exercise the masks
    src_ids = jax.random.randint(ks, (batch, src_seq_len), 1, src_vocab_size, dtype=jnp.int32)
    tgt_ids = jax.random.randint(kt, (batch, tgt_seq_len), 1, tgt_vocab_size, dtype=jnp.int32)
    src_ids = src_ids.at[0, -2:].set(PAD)
    tgt_ids = tgt_ids.at[1, -1:].set(PAD)

    fwd = jax.jit(functools.partial(transformer_forward, n_head=n_head,
                                    tgt_vocab_size=tgt_vocab_size))
    logits = fwd(params, src_ids, tgt_ids)
    jax.block_until_ready(logits)

    assert logits.shape == (batch, tgt_seq_len, tgt_vocab_size)
    assert bool(jnp.all(jnp.isfinite(logits)))
    print("KERNEL_OK")
</pallas_src>

<mosaic_0001>
module attributes {stable_mosaic.version = 11 : i64} {
  func.func @_matmul_bias_kernel(%arg0: i32, %arg1: i32, %arg2: i32, %arg3: memref<16x32xbf16, #tpu.memory_space<vmem>>, %arg4: memref<32x96xbf16, #tpu.memory_space<vmem>>, %arg5: memref<1x96xf32, #tpu.memory_space<vmem>>, %arg6: memref<16x96xbf16, #tpu.memory_space<vmem>>, %arg7: memref<16x96xf32, #tpu.memory_space<vmem>>) attributes {dimension_semantics = [#tpu.dimension_semantics<parallel>, #tpu.dimension_semantics<parallel>, #tpu.dimension_semantics<arbitrary>], iteration_bounds = array<i64: 1, 1, 1>, scalar_prefetch = 0 : i64, scratch_operands = 1 : i64, tpu.core_type = #tpu.core_type<tc>, window_params = [{transform_indices = @transform_0, window_bounds = array<i64: 16, 32>}, {transform_indices = @transform_1, window_bounds = array<i64: 32, 96>}, {transform_indices = @transform_2, window_bounds = array<i64: 1, 96>}, {transform_indices = @transform_3, window_bounds = array<i64: 16, 96>}]} {
    %c0_i32 = arith.constant 0 : i32
    %0 = arith.cmpi eq, %arg2, %c0_i32 : i32
    %1 = arith.extui %0 : i1 to i32
    %c0_i32_0 = arith.constant 0 : i32
    %2 = arith.cmpi ne, %1, %c0_i32_0 : i32
    scf.if %2 {
      %cst_10 = arith.constant 0.000000e+00 : f32
      %12 = vector.broadcast %cst_10 : f32 to vector<16x96xf32>
      %c0_11 = arith.constant 0 : index
      %c0_12 = arith.constant 0 : index
      %13 = vector.load %arg7[%c0_11, %c0_12] : memref<16x96xf32, #tpu.memory_space<vmem>>, vector<16x96xf32>
      tpu.vector_store %arg7[%c0_11, %c0_12], %12 {strides = array<i32>} : memref<16x96xf32, #tpu.memory_space<vmem>>, vector<16x96xf32>,
    } else {
    }
    %c0 = arith.constant 0 : index
    %c0_1 = arith.constant 0 : index
    %3 = vector.load %arg7[%c0, %c0_1] : memref<16x96xf32, #tpu.memory_space<vmem>>, vector<16x96xf32>
    %c0_2 = arith.constant 0 : index
    %c0_3 = arith.constant 0 : index
    %4 = vector.load %arg3[%c0_2, %c0_3] : memref<16x32xbf16, #tpu.memory_space<vmem>>, vector<16x32xbf16>
    %c0_4 = arith.constant 0 : index
    %c0_5 = arith.constant 0 : index
    %5 = vector.load %arg4[%c0_4, %c0_5] : memref<32x96xbf16, #tpu.memory_space<vmem>>, vector<32x96xbf16>
    %cst = arith.constant dense<0.000000e+00> : vector<16x96xf32>
    %6 = tpu.matmul %4, %5, %cst {dimension_numbers = #tpu.dot_dimension_numbers<[1], [0], [0], [1], [0, 0, 1, 1], [], []>} : vector<16x32xbf16>, vector<32x96xbf16>, vector<16x96xf32> -> vector<16x96xf32>
    %7 = arith.addf %3, %6 : vector<16x96xf32>
    %c0_6 = arith.constant 0 : index
    %c0_7 = arith.constant 0 : index
    %8 = vector.load %arg7[%c0_6, %c0_7] : memref<16x96xf32, #tpu.memory_space<vmem>>, vector<16x96xf32>
    tpu.vector_store %arg7[%c0_6, %c0_7], %7 {strides = array<i32>} : memref<16x96xf32, #tpu.memory_space<vmem>>, vector<16x96xf32>,
    %c0_i32_8 = arith.constant 0 : i32
    %9 = arith.cmpi eq, %arg2, %c0_i32_8 : i32
    %10 = arith.extui %9 : i1 to i32
    %c0_i32_9 = arith.constant 0 : i32
    %11 = arith.cmpi ne, %10, %c0_i32_9 : i32
    scf.if %11 {
      %c0_10 = arith.constant 0 : index
      %c0_11 = arith.constant 0 : index
      %12 = vector.load %arg7[%c0_10, %c0_11] : memref<16x96xf32, #tpu.memory_space<vmem>>, vector<16x96xf32>
      %c0_12 = arith.constant 0 : index
      %c0_13 = arith.constant 0 : index
      %13 = vector.load %arg5[%c0_12, %c0_13] : memref<1x96xf32, #tpu.memory_space<vmem>>, vector<1x96xf32>
      %14 = vector.broadcast %13 : vector<1x96xf32> to vector<16x96xf32>
      %15 = arith.addf %12, %14 : vector<16x96xf32>
      %16 = arith.truncf %15 : vector<16x96xf32> to vector<16x96xbf16>
      %c0_14 = arith.constant 0 : index
      %c0_15 = arith.constant 0 : index
      %17 = vector.load %arg6[%c0_14, %c0_15] : memref<16x96xbf16, #tpu.memory_space<vmem>>, vector<16x96xbf16>
      tpu.vector_store %arg6[%c0_14, %c0_15], %16 {strides = array<i32>} : memref<16x96xbf16, #tpu.memory_space<vmem>>, vector<16x96xbf16>,
    } else {
    }
    return
  }
  func.func @transform_0(%arg0: i32, %arg1: i32, %arg2: i32) -> (i32, i32) {
    %c0_i32 = arith.constant 0 : i32
    return %arg0, %arg2 : i32, i32
  }
  func.func @transform_1(%arg0: i32, %arg1: i32, %arg2: i32) -> (i32, i32) {
    %c0_i32 = arith.constant 0 : i32
    return %arg2, %arg1 : i32, i32
  }
  func.func @transform_2(%arg0: i32, %arg1: i32, %arg2: i32) -> (i32, i32) {
    %c0_i32 = arith.constant 0 : i32
    %c0_i32_0 = arith.constant 0 : i32
    return %c0_i32, %arg1 : i32, i32
  }
  func.func @transform_3(%arg0: i32, %arg1: i32, %arg2: i32) -> (i32, i32) {
    %c0_i32 = arith.constant 0 : i32
    return %arg0, %arg1 : i32, i32
  }
}

module attributes {stable_mosaic.version = 11 : i64} {
  func.func @_linear_add_ln_kernel(%arg0: i32, %arg1: i32, %arg2: memref<16x32xbf16, #tpu.memory_space<vmem>>, %arg3: memref<32x32xbf16, #tpu.memory_space<vmem>>, %arg4: memref<1x32xf32, #tpu.memory_space<vmem>>, %arg5: memref<16x32xbf16, #tpu.memory_space<vmem>>, %arg6: memref<1x32xf32, #tpu.memory_space<vmem>>, %arg7: memref<1x32xf32, #tpu.memory_space<vmem>>, %arg8: memref<16x32xbf16, #tpu.memory_space<vmem>>, %arg9: memref<16x32xf32, #tpu.memory_space<vmem>>) attributes {dimension_semantics = [#tpu.dimension_semantics<parallel>, #tpu.dimension_semantics<arbitrary>], iteration_bounds = array<i64: 1, 1>, scalar_prefetch = 0 : i64, scratch_operands = 1 : i64, tpu.core_type = #tpu.core_type<tc>, window_params = [{transform_indices = @transform_0, window_bounds = array<i64: 16, 32>}, {transform_indices = @transform_1, window_bounds = array<i64: 32, 32>}, {pipeline_mode = #tpu.pipeline_mode<synchronous>, transform_indices = @transform_2, window_bounds = array<i64: 1, 32>}, {transform_indices = @transform_3, window_bounds = array<i64: 16, 32>}, {pipeline_mode = #tpu.pipeline_mode<synchronous>, transform_indices = @transform_4, window_bounds = array<i64: 1, 32>}, {pipeline_mode = #tpu.pipeline_mode<synchronous>, transform_indices = @transform_5, window_bounds = array<i64: 1, 32>}, {transform_indices = @transform_6, window_bounds = array<i64: 16, 32>}]} {
    %c0_i32 = arith.constant 0 : i32
    %0 = arith.cmpi eq, %arg1, %c0_i32 : i32
    %1 = arith.extui %0 : i1 to i32
    %c0_i32_0 = arith.constant 0 : i32
    %2 = arith.cmpi ne, %1, %c0_i32_0 : i32
    scf.if %2 {
      %cst_10 = arith.constant 0.000000e+00 : f32
      %12 = vector.broadcast %cst_10 : f32 to vector<16x32xf32>
      %c0_11 = arith.constant 0 : index
      %c0_12 = arith.constant 0 : index
      %13 = vector.load %arg9[%c0_11, %c0_12] : memref<16x32xf32, #tpu.memory_space<vmem>>, vector<16x32xf32>
      tpu.vector_store %arg9[%c0_11, %c0_12], %12 {strides = array<i32>} : memref<16x32xf32, #tpu.memory_space<vmem>>, vector<16x32xf32>,
    } else {
    }
    %c0 = arith.constant 0 : index
    %c0_1 = arith.constant 0 : index
    %3 = vector.load %arg9[%c0, %c0_1] : memref<16x32xf32, #tpu.memory_space<vmem>>, vector<16x32xf32>
    %c0_2 = arith.constant 0 : index
    %c0_3 = arith.constant 0 : index
    %4 = vector.load %arg2[%c0_2, %c0_3] : memref<16x32xbf16, #tpu.memory_space<vmem>>, vector<16x32xbf16>
    %c0_4 = arith.constant 0 : index
    %c0_5 = arith.constant 0 : index
    %5 = vector.load %arg3[%c0_4, %c0_5] : memref<32x32xbf16, #tpu.memory_space<vmem>>, vector<32x32xbf16>
    %cst = arith.constant dense<0.000000e+00> : vector<16x32xf32>
    %6 = tpu.matmul %4, %5, %cst {dimension_numbers = #tpu.dot_dimension_numbers<[1], [0], [0], [1], [0, 0, 1, 1], [], []>} : vector<16x32xbf16>, vector<32x32xbf16>, vector<16x32xf32> -> vector<16x32xf32>
    %7 = arith.addf %3, %6 : vector<16x32xf32>
    %c0_6 = arith.constant 0 : index
    %c0_7 = arith.constant 0 : index
    %8 = vector.load %arg9[%c0_6, %c0_7] : memref<16x32xf32, #tpu.memory_space<vmem>>, vector<16x32xf32>
    tpu.vector_store %arg9[%c0_6, %c0_7], %7 {strides = array<i32>} : memref<16x32xf32, #tpu.memory_space<vmem>>, vector<16x32xf32>,
    %c0_i32_8 = arith.constant 0 : i32
    %9 = arith.cmpi eq, %arg1, %c0_i32_8 : i32
    %10 = arith.extui %9 : i1 to i32
    %c0_i32_9 = arith.constant 0 : i32
    %11 = arith.cmpi ne, %10, %c0_i32_9 : i32
    scf.if %11 {
      %c0_10 = arith.constant 0 : index
      %c0_11 = arith.constant 0 : index
      %12 = vector.load %arg9[%c0_10, %c0_11] : memref<16x32xf32, #tpu.memory_space<vmem>>, vector<16x32xf32>
      %c0_12 = arith.constant 0 : index
      %c0_13 = arith.constant 0 : index
      %13 = vector.load %arg4[%c0_12, %c0_13] : memref<1x32xf32, #tpu.memory_space<vmem>>, vector<1x32xf32>
      %14 = vector.broadcast %13 : vector<1x32xf32> to vector<16x32xf32>
      %15 = arith.addf %12, %14 : vector<16x32xf32>
      %c0_14 = arith.constant 0 : index
      %c0_15 = arith.constant 0 : index
      %16 = vector.load %arg5[%c0_14, %c0_15] : memref<16x32xbf16, #tpu.memory_space<vmem>>, vector<16x32xbf16>
      %17 = arith.extf %16 : vector<16x32xbf16> to vector<16x32xf32>
      %18 = arith.addf %15, %17 : vector<16x32xf32>
      %cst_16 = arith.constant dense<0.000000e+00> : vector<16xf32>
      %19 = vector.multi_reduction <add>, %18, %cst_16 [1] : vector<16x32xf32> to vector<16xf32>
      %20 = vector.shape_cast %19 : vector<16xf32> to vector<16x1xf32>
      %cst_17 = arith.constant 3.200000e+01 : f32
      %21 = vector.broadcast %cst_17 : f32 to vector<16x1xf32>
      %22 = arith.divf %20, %21 : vector<16x1xf32>
      %23 = vector.broadcast %22 : vector<16x1xf32> to vector<16x32xf32>
      %24 = arith.subf %18, %23 : vector<16x32xf32>
      %25 = arith.mulf %24, %24 : vector<16x32xf32>
      %cst_18 = arith.constant dense<0.000000e+00> : vector<16xf32>
      %26 = vector.multi_reduction <add>, %25, %cst_18 [1] : vector<16x32xf32> to vector<16xf32>
      %27 = vector.shape_cast %26 : vector<16xf32> to vector<16x1xf32>
      %cst_19 = arith.constant 3.200000e+01 : f32
      %28 = vector.broadcast %cst_19 : f32 to vector<16x1xf32>
      %29 = arith.divf %27, %28 : vector<16x1xf32>
      %cst_20 = arith.constant 9.99999974E-6 : f32
      %30 = vector.broadcast %cst_20 : f32 to vector<16x1xf32>
      %31 = arith.addf %29, %30 : vector<16x1xf32>
      %32 = math.rsqrt %31 : vector<16x1xf32>
      %33 = vector.broadcast %32 : vector<16x1xf32> to vector<16x32xf32>
      %34 = arith.mulf %24, %33 : vector<16x32xf32>
      %c0_21 = arith.constant 0 : index
      %c0_22 = arith.constant 0 : index
      %35 = vector.load %arg6[%c0_21, %c0_22] : memref<1x32xf32, #tpu.memory_space<vmem>>, vector<1x32xf32>
      %36 = vector.broadcast %35 : vector<1x32xf32> to vector<16x32xf32>
      %37 = arith.mulf %34, %36 : vector<16x32xf32>
      %c0_23 = arith.constant 0 : index
      %c0_24 = arith.constant 0 : index
      %38 = vector.load %arg7[%c0_23, %c0_24] : memref<1x32xf32, #tpu.memory_space<vmem>>, vector<1x32xf32>
      %39 = vector.broadcast %38 : vector<1x32xf32> to vector<16x32xf32>
      %40 = arith.addf %37, %39 : vector<16x32xf32>
      %41 = arith.truncf %40 : vector<16x32xf32> to vector<16x32xbf16>
      %c0_25 = arith.constant 0 : index
      %c0_26 = arith.constant 0 : index
      %42 = vector.load %arg8[%c0_25, %c0_26] : memref<16x32xbf16, #tpu.memory_space<vmem>>, vector<16x32xbf16>
      tpu.vector_store %arg8[%c0_25, %c0_26], %41 {strides = array<i32>} : memref<16x32xbf16, #tpu.memory_space<vmem>>, vector<16x32xbf16>,
    } else {
    }
    return
  }
  func.func @transform_0(%arg0: i32, %arg1: i32) -> (i32, i32) {
    %c0_i32 = arith.constant 0 : i32
    return %arg0, %arg1 : i32, i32
  }
  func.func @transform_1(%arg0: i32, %arg1: i32) -> (i32, i32) {
    %c0_i32 = arith.constant 0 : i32
    %c0_i32_0 = arith.constant 0 : i32
    return %arg1, %c0_i32 : i32, i32
  }
  func.func @transform_2(%arg0: i32, %arg1: i32) -> (i32, i32) {
    %c0_i32 = arith.constant 0 : i32
    %c0_i32_0 = arith.constant 0 : i32
    %c0_i32_1 = arith.constant 0 : i32
    return %c0_i32, %c0_i32_0 : i32, i32
  }
  func.func @transform_3(%arg0: i32, %arg1: i32) -> (i32, i32) {
    %c0_i32 = arith.constant 0 : i32
    %c0_i32_0 = arith.constant 0 : i32
    return %arg0, %c0_i32 : i32, i32
  }
  func.func @transform_4(%arg0: i32, %arg1: i32) -> (i32, i32) {
    %c0_i32 = arith.constant 0 : i32
    %c0_i32_0 = arith.constant 0 : i32
    %c0_i32_1 = arith.constant 0 : i32
    return %c0_i32, %c0_i32_0 : i32, i32
  }
  func.func @transform_5(%arg0: i32, %arg1: i32) -> (i32, i32) {
    %c0_i32 = arith.constant 0 : i32
    %c0_i32_0 = arith.constant 0 : i32
    %c0_i32_1 = arith.constant 0 : i32
    return %c0_i32, %c0_i32_0 : i32, i32
  }
  func.func @transform_6(%arg0: i32, %arg1: i32) -> (i32, i32) {
    %c0_i32 = arith.constant 0 : i32
    %c0_i32_0 = arith.constant 0 : i32
    return %arg0, %c0_i32 : i32, i32
  }
}

module attributes {stable_mosaic.version = 11 : i64} {
  func.func @_flash_mha_kernel(%arg0: i32, %arg1: i32, %arg2: i32, %arg3: i32, %arg4: memref<1x1x1x8x8xbf16, #tpu.memory_space<vmem>>, %arg5: memref<1x1x1x8x8xbf16, #tpu.memory_space<vmem>>, %arg6: memref<1x1x1x8x8xbf16, #tpu.memory_space<vmem>>, %arg7: memref<1x1x8xf32, #tpu.memory_space<vmem>>, %arg8: memref<1x1x8x8xbf16, #tpu.memory_space<vmem>>, %arg9: memref<8x1xf32, #tpu.memory_space<vmem>>, %arg10: memref<8x1xf32, #tpu.memory_space<vmem>>, %arg11: memref<8x8xf32, #tpu.memory_space<vmem>>) attributes {dimension_semantics = [#tpu.dimension_semantics<parallel>, #tpu.dimension_semantics<parallel>, #tpu.dimension_semantics<parallel>, #tpu.dimension_semantics<arbitrary>], iteration_bounds = array<i64: 2, 4, 1, 1>, scalar_prefetch = 0 : i64, scratch_operands = 3 : i64, tpu.core_type = #tpu.core_type<tc>, window_params = [{transform_indices = @transform_0, window_bounds = array<i64: 1, 1, 1, 8, 8>}, {transform_indices = @transform_1, window_bounds = array<i64: 1, 1, 1, 8, 8>}, {transform_indices = @transform_2, window_bounds = array<i64: 1, 1, 1, 8, 8>}, {transform_indices = @transform_3, window_bounds = array<i64: 1, 1, 8>}, {transform_indices = @transform_4, window_bounds = array<i64: 1, 1, 8, 8>}]} {
    %c0_i32 = arith.constant 0 : i32
    %0 = arith.cmpi eq, %arg3, %c0_i32 : i32
    %1 = arith.extui %0 : i1 to i32
    %c0_i32_0 = arith.constant 0 : i32
    %2 = arith.cmpi ne, %1, %c0_i32_0 : i32
    scf.if %2 {
      %cst_37 = arith.constant -1.000000e+30 : f32
      %51 = vector.broadcast %cst_37 : f32 to vector<8x1xf32>
      %c0_38 = arith.constant 0 : index
      %c0_39 = arith.constant 0 : index
      %52 = vector.load %arg9[%c0_38, %c0_39] : memref<8x1xf32, #tpu.memory_space<vmem>>, vector<8x1xf32>
      tpu.vector_store %arg9[%c0_38, %c0_39], %51 {strides = array<i32>} : memref<8x1xf32, #tpu.memory_space<vmem>>, vector<8x1xf32>,
      %cst_40 = arith.constant 0.000000e+00 : f32
      %53 = vector.broadcast %cst_40 : f32 to vector<8x1xf32>
      %c0_41 = arith.constant 0 : index
      %c0_42 = arith.constant 0 : index
      %54 = vector.load %arg10[%c0_41, %c0_42] : memref<8x1xf32, #tpu.memory_space<vmem>>, vector<8x1xf32>
      tpu.vector_store %arg10[%c0_41, %c0_42], %53 {strides = array<i32>} : memref<8x1xf32, #tpu.memory_space<vmem>>, vector<8x1xf32>,
      %cst_43 = arith.constant 0.000000e+00 : f32
      %55 = vector.broadcast %cst_43 : f32 to vector<8x8xf32>
      %c0_44 = arith.constant 0 : index
      %c0_45 = arith.constant 0 : index
      %56 = vector.load %arg11[%c0_44, %c0_45] : memref<8x8xf32, #tpu.memory_space<vmem>>, vector<8x8xf32>
      tpu.vector_store %arg11[%c0_44, %c0_45], %55 {strides = array<i32>} : memref<8x8xf32, #tpu.memory_space<vmem>>, vector<8x8xf32>,
    } else {
    }
    %c0 = arith.constant 0 : index
    %c0_1 = arith.constant 0 : index
    %c0_2 = arith.constant 0 : index
    %c0_3 = arith.constant 0 : index
    %c0_4 = arith.constant 0 : index
    %3 = vector.load %arg4[%c0, %c0_1, %c0_2, %c0_3, %c0_4] : memref<1x1x1x8x8xbf16, #tpu.memory_space<vmem>>, vector<1x1x1x8x8xbf16>
    %4 = vector.shape_cast %3 : vector<1x1x1x8x8xbf16> to vector<8x8xbf16>
    %c0_5 = arith.constant 0 : index
    %c0_6 = arith.constant 0 : index
    %c0_7 = arith.constant 0 : index
    %c0_8 = arith.constant 0 : index
    %c0_9 = arith.constant 0 : index
    %5 = vector.load %arg5[%c0_5, %c0_6, %c0_7, %c0_8, %c0_9] : memref<1x1x1x8x8xbf16, #tpu.memory_space<vmem>>, vector<1x1x1x8x8xbf16>
    %6 = vector.shape_cast %5 : vector<1x1x1x8x8xbf16> to vector<8x8xbf16>
    %cst = arith.constant dense<0.000000e+00> : vector<8x8xf32>
    %7 = tpu.matmul %4, %6, %cst {dimension_numbers = #tpu.dot_dimension_numbers<[1], [1], [0], [0], [0, 0, 1, 0], [], []>} : vector<8x8xbf16>, vector<8x8xbf16>, vector<8x8xf32> -> vector<8x8xf32>
    %c0_10 = arith.constant 0 : index
    %c0_11 = arith.constant 0 : index
    %c0_12 = arith.constant 0 : index
    %8 = vector.load %arg7[%c0_10, %c0_11, %c0_12] : memref<1x1x8xf32, #tpu.memory_space<vmem>>, vector<1x1x8xf32>
    %9 = vector.shape_cast %8 : vector<1x1x8xf32> to vector<1x8xf32>
    %10 = vector.broadcast %9 : vector<1x8xf32> to vector<8x8xf32>
    %11 = arith.addf %7, %10 : vector<8x8xf32>
    %c8_i32 = arith.constant 8 : i32
    %12 = arith.muli %arg2, %c8_i32 : i32
    %13 = tpu.iota {dimensions = array<i32: 0>} : vector<8x8xi32>
    %14 = vector.broadcast %12 : i32 to vector<8x8xi32>
    %15 = arith.addi %14, %13 : vector<8x8xi32>
    %c8_i32_13 = arith.constant 8 : i32
    %16 = arith.muli %arg3, %c8_i32_13 : i32
    %17 = tpu.iota {dimensions = array<i32: 1>} : vector<8x8xi32>
    %18 = vector.broadcast %16 : i32 to vector<8x8xi32>
    %19 = arith.addi %18, %17 : vector<8x8xi32>
    %20 = arith.cmpi sle, %19, %15 : vector<8x8xi32>
    %cst_14 = arith.constant -1.000000e+09 : f32
    %21 = vector.broadcast %cst_14 : f32 to vector<8x8xf32>
    %22 = arith.select %20, %11, %21 : vector<8x8xi1>, vector<8x8xf32>
    %c0_15 = arith.constant 0 : index
    %c0_16 = arith.constant 0 : index
    %23 = vector.load %arg9[%c0_15, %c0_16] : memref<8x1xf32, #tpu.memory_space<vmem>>, vector<8x1xf32>
    %cst_17 = arith.constant dense<0xFF800000> : vector<8xf32>
    %24 = vector.multi_reduction <maximumf>, %22, %cst_17 [1] : vector<8x8xf32> to vector<8xf32>
    %25 = vector.shape_cast %24 : vector<8xf32> to vector<8x1xf32>
    %26 = arith.maximumf %23, %25 : vector<8x1xf32>
    %27 = arith.subf %23, %26 : vector<8x1xf32>
    %28 = math.exp %27 : vector<8x1xf32>
    %29 = vector.broadcast %26 : vector<8x1xf32> to vector<8x8xf32>
    %30 = arith.subf %22, %29 : vector<8x8xf32>
    %31 = math.exp %30 : vector<8x8xf32>
    %c0_18 = arith.constant 0 : index
    %c0_19 = arith.constant 0 : index
    %32 = vector.load %arg10[%c0_18, %c0_19] : memref<8x1xf32, #tpu.memory_space<vmem>>, vector<8x1xf32>
    %33 = arith.mulf %28, %32 : vector<8x1xf32>
    %cst_20 = arith.constant dense<0.000000e+00> : vector<8xf32>
    %34 = vector.multi_reduction <add>, %31, %cst_20 [1] : vector<8x8xf32> to vector<8xf32>
    %35 = vector.shape_cast %34 : vector<8xf32> to vector<8x1xf32>
    %36 = arith.addf %33, %35 : vector<8x1xf32>
    %c0_21 = arith.constant 0 : index
    %c0_22 = arith.constant 0 : index
    %37 = vector.load %arg10[%c0_21, %c0_22] : memref<8x1xf32, #tpu.memory_space<vmem>>, vector<8x1xf32>
    tpu.vector_store %arg10[%c0_21, %c0_22], %36 {strides = array<i32>} : memref<8x1xf32, #tpu.memory_space<vmem>>, vector<8x1xf32>,
    %c0_23 = arith.constant 0 : index
    %c0_24 = arith.constant 0 : index
    %38 = vector.load %arg11[%c0_23, %c0_24] : memref<8x8xf32, #tpu.memory_space<vmem>>, vector<8x8xf32>
    %39 = vector.broadcast %28 : vector<8x1xf32> to vector<8x8xf32>
    %40 = arith.mulf %39, %38 : vector<8x8xf32>
    %41 = arith.truncf %31 : vector<8x8xf32> to vector<8x8xbf16>
    %c0_25 = arith.constant 0 : index
    %c0_26 = arith.constant 0 : index
    %c0_27 = arith.constant 0 : index
    %c0_28 = arith.constant 0 : index
    %c0_29 = arith.constant 0 : index
    %42 = vector.load %arg6[%c0_25, %c0_26, %c0_27, %c0_28, %c0_29] : memref<1x1x1x8x8xbf16, #tpu.memory_space<vmem>>, vector<1x1x1x8x8xbf16>
    %43 = vector.shape_cast %42 : vector<1x1x1x8x8xbf16> to vector<8x8xbf16>
    %cst_30 = arith.constant dense<0.000000e+00> : vector<8x8xf32>
    %44 = tpu.matmul %41, %43, %cst_30 {dimension_numbers = #tpu.dot_dimension_numbers<[1], [0], [0], [1], [0, 0, 1, 1], [], []>} : vector<8x8xbf16>, vector<8x8xbf16>, vector<8x8xf32> -> vector<8x8xf32>
    %45 = arith.addf %40, %44 : vector<8x8xf32>
    %c0_31 = arith.constant 0 : index
    %c0_32 = arith.constant 0 : index
    %46 = vector.load %arg11[%c0_31, %c0_32] : memref<8x8xf32, #tpu.memory_space<vmem>>, vector<8x8xf32>
    tpu.vector_store %arg11[%c0_31, %c0_32], %45 {strides = array<i32>} : memref<8x8xf32, #tpu.memory_space<vmem>>, vector<8x8xf32>,
    %c0_33 = arith.constant 0 : index
    %c0_34 = arith.constant 0 : index
    %47 = vector.load %arg9[%c0_33, %c0_34] : memref<8x1xf32, #tpu.memory_space<vmem>>, vector<8x1xf32>
    tpu.vector_store %arg9[%c0_33, %c0_34], %26 {strides = array<i32>} : memref<8x1xf32, #tpu.memory_space<vmem>>, vector<8x1xf32>,
    %c0_i32_35 = arith.constant 0 : i32
    %48 = arith.cmpi eq, %arg3, %c0_i32_35 : i32
    %49 = arith.extui %48 : i1 to i32
    %c0_i32_36 = arith.constant 0 : i32
    %50 = arith.cmpi ne, %49, %c0_i32_36 : i32
    scf.if %50 {
      %c0_37 = arith.constant 0 : index
      %c0_38 = arith.constant 0 : index
      %51 = vector.load %arg11[%c0_37, %c0_38] : memref<8x8xf32, #tpu.memory_space<vmem>>, vector<8x8xf32>
      %c0_39 = arith.constant 0 : index
      %c0_40 = arith.constant 0 : index
      %52 = vector.load %arg10[%c0_39, %c0_40] : memref<8x1xf32, #tpu.memory_space<vmem>>, vector<8x1xf32>
      %53 = tpu.reciprocal %52 {approx = true} : vector<8x1xf32> -> vector<8x1xf32>
      %54 = vector.broadcast %53 : vector<8x1xf32> to vector<8x8xf32>
      %55 = arith.mulf %51, %54 : vector<8x8xf32>
      %56 = arith.truncf %55 : vector<8x8xf32> to vector<8x8xbf16>
      %c0_41 = arith.constant 0 : index
      %c0_42 = arith.constant 0 : index
      %c0_43 = arith.constant 0 : index
      %c0_44 = arith.constant 0 : index
      %57 = vector.load %arg8[%c0_41, %c0_42, %c0_43, %c0_44] : memref<1x1x8x8xbf16, #tpu.memory_space<vmem>>, vector<1x1x8x8xbf16>
      %58 = vector.shape_cast %57 : vector<1x1x8x8xbf16> to vector<8x8xbf16>
      %59 = vector.shape_cast %56 : vector<8x8xbf16> to vector<1x1x8x8xbf16>
      tpu.vector_store %arg8[%c0_41, %c0_42, %c0_43, %c0_44], %59 {strides = array<i32>} : memref<1x1x8x8xbf16, #tpu.memory_space<vmem>>, vector<1x1x8x8xbf16>,
    } else {
    }
    return
  }
  func.func @transform_0(%arg0: i32, %arg1: i32, %arg2: i32, %arg3: i32) -> (i32, i32, i32, i32, i32) {
    %c0_i32 = arith.constant 0 : i32
    %c0_i32_0 = arith.constant 0 : i32
    %c0_i32_1 = arith.constant 0 : i32
    return %c0_i32, %arg0, %arg1, %arg2, %c0_i32_0 : i32, i32, i32, i32, i32
  }
  func.func @transform_1(%arg0: i32, %arg1: i32, %arg2: i32, %arg3: i32) -> (i32, i32, i32, i32, i32) {
    %c1_i32 = arith.constant 1 : i32
    %c0_i32 = arith.constant 0 : i32
    %c0_i32_0 = arith.constant 0 : i32
    return %c1_i32, %arg0, %arg1, %arg3, %c0_i32 : i32, i32, i32, i32, i32
  }
  func.func @transform_2(%arg0: i32, %arg1: i32, %arg2: i32, %arg3: i32) -> (i32, i32, i32, i32, i32) {
    %c2_i32 = arith.constant 2 : i32
    %c0_i32 = arith.constant 0 : i32
    %c0_i32_0 = arith.constant 0 : i32
    return %c2_i32, %arg0, %arg1, %arg3, %c0_i32 : i32, i32, i32, i32, i32
  }
  func.func @transform_3(%arg0: i32, %arg1: i32, %arg2: i32, %arg3: i32) -> (i32, i32, i32) {
    %c0_i32 = arith.constant 0 : i32
    %c0_i32_0 = arith.constant 0 : i32
    return %arg0, %c0_i32, %arg3 : i32, i32, i32
  }
  func.func @transform_4(%arg0: i32, %arg1: i32, %arg2: i32, %arg3: i32) -> (i32, i32, i32, i32) {
    %c0_i32 = arith.constant 0 : i32
    %c0_i32_0 = arith.constant 0 : i32
    return %arg0, %arg1, %arg2, %c0_i32 : i32, i32, i32, i32
  }
}

module attributes {stable_mosaic.version = 11 : i64} {
  func.func @_matmul_bias_kernel(%arg0: i32, %arg1: i32, %arg2: i32, %arg3: memref<16x32xbf16, #tpu.memory_space<vmem>>, %arg4: memref<32x32xbf16, #tpu.memory_space<vmem>>, %arg5: memref<1x32xf32, #tpu.memory_space<vmem>>, %arg6: memref<16x32xbf16, #tpu.memory_space<vmem>>, %arg7: memref<16x32xf32, #tpu.memory_space<vmem>>) attributes {dimension_semantics = [#tpu.dimension_semantics<parallel>, #tpu.dimension_semantics<parallel>, #tpu.dimension_semantics<arbitrary>], iteration_bounds = array<i64: 1, 1, 1>, scalar_prefetch = 0 : i64, scratch_operands = 1 : i64, tpu.core_type = #tpu.core_type<tc>, window_params = [{transform_indices = @transform_0, window_bounds = array<i64: 16, 32>}, {transform_indices = @transform_1, window_bounds = array<i64: 32, 32>}, {transform_indices = @transform_2, window_bounds = array<i64: 1, 32>}, {transform_indices = @transform_3, window_bounds = array<i64: 16, 32>}]} {
    %c0_i32 = arith.constant 0 : i32
    %0 = arith.cmpi eq, %arg2, %c0_i32 : i32
    %1 = arith.extui %0 : i1 to i32
    %c0_i32_0 = arith.constant 0 : i32
    %2 = arith.cmpi ne, %1, %c0_i32_0 : i32
    scf.if %2 {
      %cst_10 = arith.constant 0.000000e+00 : f32
      %12 = vector.broadcast %cst_10 : f32 to vector<16x32xf32>
      %c0_11 = arith.constant 0 : index
      %c0_12 = arith.constant 0 : index
      %13 = vector.load %arg7[%c0_11, %c0_12] : memref<16x32xf32, #tpu.memory_space<vmem>>, vector<16x32xf32>
      tpu.vector_store %arg7[%c0_11, %c0_12], %12 {strides = array<i32>} : memref<16x32xf32, #tpu.memory_space<vmem>>, vector<16x32xf32>,
    } else {
    }
    %c0 = arith.constant 0 : index
    %c0_1 = arith.constant 0 : index
    %3 = vector.load %arg7[%c0, %c0_1] : memref<16x32xf32, #tpu.memory_space<vmem>>, vector<16x32xf32>
    %c0_2 = arith.constant 0 : index
    %c0_3 = arith.constant 0 : index
    %4 = vector.load %arg3[%c0_2, %c0_3] : memref<16x32xbf16, #tpu.memory_space<vmem>>, vector<16x32xbf16>
    %c0_4 = arith.constant 0 : index
    %c0_5 = arith.constant 0 : index
    %5 = vector.load %arg4[%c0_4, %c0_5] : memref<32x32xbf16, #tpu.memory_space<vmem>>, vector<32x32xbf16>
    %cst = arith.constant dense<0.000000e+00> : vector<16x32xf32>
    %6 = tpu.matmul %4, %5, %cst {dimension_numbers = #tpu.dot_dimension_numbers<[1], [0], [0], [1], [0, 0, 1, 1], [], []>} : vector<16x32xbf16>, vector<32x32xbf16>, vector<16x32xf32> -> vector<16x32xf32>
    %7 = arith.addf %3, %6 : vector<16x32xf32>
    %c0_6 = arith.constant 0 : index
    %c0_7 = arith.constant 0 : index
    %8 = vector.load %arg7[%c0_6, %c0_7] : memref<16x32xf32, #tpu.memory_space<vmem>>, vector<16x32xf32>
    tpu.vector_store %arg7[%c0_6, %c0_7], %7 {strides = array<i32>} : memref<16x32xf32, #tpu.memory_space<vmem>>, vector<16x32xf32>,
    %c0_i32_8 = arith.constant 0 : i32
    %9 = arith.cmpi eq, %arg2, %c0_i32_8 : i32
    %10 = arith.extui %9 : i1 to i32
    %c0_i32_9 = arith.constant 0 : i32
    %11 = arith.cmpi ne, %10, %c0_i32_9 : i32
    scf.if %11 {
      %c0_10 = arith.constant 0 : index
      %c0_11 = arith.constant 0 : index
      %12 = vector.load %arg7[%c0_10, %c0_11] : memref<16x32xf32, #tpu.memory_space<vmem>>, vector<16x32xf32>
      %c0_12 = arith.constant 0 : index
      %c0_13 = arith.constant 0 : index
      %13 = vector.load %arg5[%c0_12, %c0_13] : memref<1x32xf32, #tpu.memory_space<vmem>>, vector<1x32xf32>
      %14 = vector.broadcast %13 : vector<1x32xf32> to vector<16x32xf32>
      %15 = arith.addf %12, %14 : vector<16x32xf32>
      %16 = arith.truncf %15 : vector<16x32xf32> to vector<16x32xbf16>
      %c0_14 = arith.constant 0 : index
      %c0_15 = arith.constant 0 : index
      %17 = vector.load %arg6[%c0_14, %c0_15] : memref<16x32xbf16, #tpu.memory_space<vmem>>, vector<16x32xbf16>
      tpu.vector_store %arg6[%c0_14, %c0_15], %16 {strides = array<i32>} : memref<16x32xbf16, #tpu.memory_space<vmem>>, vector<16x32xbf16>,
    } else {
    }
    return
  }
  func.func @transform_0(%arg0: i32, %arg1: i32, %arg2: i32) -> (i32, i32) {
    %c0_i32 = arith.constant 0 : i32
    return %arg0, %arg2 : i32, i32
  }
  func.func @transform_1(%arg0: i32, %arg1: i32, %arg2: i32) -> (i32, i32) {
    %c0_i32 = arith.constant 0 : i32
    return %arg2, %arg1 : i32, i32
  }
  func.func @transform_2(%arg0: i32, %arg1: i32, %arg2: i32) -> (i32, i32) {
    %c0_i32 = arith.constant 0 : i32
    %c0_i32_0 = arith.constant 0 : i32
    return %c0_i32, %arg1 : i32, i32
  }
  func.func @transform_3(%arg0: i32, %arg1: i32, %arg2: i32) -> (i32, i32) {
    %c0_i32 = arith.constant 0 : i32
    return %arg0, %arg1 : i32, i32
  }
}

module attributes {stable_mosaic.version = 11 : i64} {
  func.func @_matmul_bias_kernel(%arg0: i32, %arg1: i32, %arg2: i32, %arg3: memref<16x32xbf16, #tpu.memory_space<vmem>>, %arg4: memref<32x64xbf16, #tpu.memory_space<vmem>>, %arg5: memref<1x64xf32, #tpu.memory_space<vmem>>, %arg6: memref<16x64xbf16, #tpu.memory_space<vmem>>, %arg7: memref<16x64xf32, #tpu.memory_space<vmem>>) attributes {dimension_semantics = [#tpu.dimension_semantics<parallel>, #tpu.dimension_semantics<parallel>, #tpu.dimension_semantics<arbitrary>], iteration_bounds = array<i64: 1, 1, 1>, scalar_prefetch = 0 : i64, scratch_operands = 1 : i64, tpu.core_type = #tpu.core_type<tc>, window_params = [{transform_indices = @transform_0, window_bounds = array<i64: 16, 32>}, {transform_indices = @transform_1, window_bounds = array<i64: 32, 64>}, {transform_indices = @transform_2, window_bounds = array<i64: 1, 64>}, {transform_indices = @transform_3, window_bounds = array<i64: 16, 64>}]} {
    %c0_i32 = arith.constant 0 : i32
    %0 = arith.cmpi eq, %arg2, %c0_i32 : i32
    %1 = arith.extui %0 : i1 to i32
    %c0_i32_0 = arith.constant 0 : i32
    %2 = arith.cmpi ne, %1, %c0_i32_0 : i32
    scf.if %2 {
      %cst_10 = arith.constant 0.000000e+00 : f32
      %12 = vector.broadcast %cst_10 : f32 to vector<16x64xf32>
      %c0_11 = arith.constant 0 : index
      %c0_12 = arith.constant 0 : index
      %13 = vector.load %arg7[%c0_11, %c0_12] : memref<16x64xf32, #tpu.memory_space<vmem>>, vector<16x64xf32>
      tpu.vector_store %arg7[%c0_11, %c0_12], %12 {strides = array<i32>} : memref<16x64xf32, #tpu.memory_space<vmem>>, vector<16x64xf32>,
    } else {
    }
    %c0 = arith.constant 0 : index
    %c0_1 = arith.constant 0 : index
    %3 = vector.load %arg7[%c0, %c0_1] : memref<16x64xf32, #tpu.memory_space<vmem>>, vector<16x64xf32>
    %c0_2 = arith.constant 0 : index
    %c0_3 = arith.constant 0 : index
    %4 = vector.load %arg3[%c0_2, %c0_3] : memref<16x32xbf16, #tpu.memory_space<vmem>>, vector<16x32xbf16>
    %c0_4 = arith.constant 0 : index
    %c0_5 = arith.constant 0 : index
    %5 = vector.load %arg4[%c0_4, %c0_5] : memref<32x64xbf16, #tpu.memory_space<vmem>>, vector<32x64xbf16>
    %cst = arith.constant dense<0.000000e+00> : vector<16x64xf32>
    %6 = tpu.matmul %4, %5, %cst {dimension_numbers = #tpu.dot_dimension_numbers<[1], [0], [0], [1], [0, 0, 1, 1], [], []>} : vector<16x32xbf16>, vector<32x64xbf16>, vector<16x64xf32> -> vector<16x64xf32>
    %7 = arith.addf %3, %6 : vector<16x64xf32>
    %c0_6 = arith.constant 0 : index
    %c0_7 = arith.constant 0 : index
    %8 = vector.load %arg7[%c0_6, %c0_7] : memref<16x64xf32, #tpu.memory_space<vmem>>, vector<16x64xf32>
    tpu.vector_store %arg7[%c0_6, %c0_7], %7 {strides = array<i32>} : memref<16x64xf32, #tpu.memory_space<vmem>>, vector<16x64xf32>,
    %c0_i32_8 = arith.constant 0 : i32
    %9 = arith.cmpi eq, %arg2, %c0_i32_8 : i32
    %10 = arith.extui %9 : i1 to i32
    %c0_i32_9 = arith.constant 0 : i32
    %11 = arith.cmpi ne, %10, %c0_i32_9 : i32
    scf.if %11 {
      %c0_10 = arith.constant 0 : index
      %c0_11 = arith.constant 0 : index
      %12 = vector.load %arg7[%c0_10, %c0_11] : memref<16x64xf32, #tpu.memory_space<vmem>>, vector<16x64xf32>
      %c0_12 = arith.constant 0 : index
      %c0_13 = arith.constant 0 : index
      %13 = vector.load %arg5[%c0_12, %c0_13] : memref<1x64xf32, #tpu.memory_space<vmem>>, vector<1x64xf32>
      %14 = vector.broadcast %13 : vector<1x64xf32> to vector<16x64xf32>
      %15 = arith.addf %12, %14 : vector<16x64xf32>
      %16 = arith.truncf %15 : vector<16x64xf32> to vector<16x64xbf16>
      %c0_14 = arith.constant 0 : index
      %c0_15 = arith.constant 0 : index
      %17 = vector.load %arg6[%c0_14, %c0_15] : memref<16x64xbf16, #tpu.memory_space<vmem>>, vector<16x64xbf16>
      tpu.vector_store %arg6[%c0_14, %c0_15], %16 {strides = array<i32>} : memref<16x64xbf16, #tpu.memory_space<vmem>>, vector<16x64xbf16>,
    } else {
    }
    return
  }
  func.func @transform_0(%arg0: i32, %arg1: i32, %arg2: i32) -> (i32, i32) {
    %c0_i32 = arith.constant 0 : i32
    return %arg0, %arg2 : i32, i32
  }
  func.func @transform_1(%arg0: i32, %arg1: i32, %arg2: i32) -> (i32, i32) {
    %c0_i32 = arith.constant 0 : i32
    return %arg2, %arg1 : i32, i32
  }
  func.func @transform_2(%arg0: i32, %arg1: i32, %arg2: i32) -> (i32, i32) {
    %c0_i32 = arith.constant 0 : i32
    %c0_i32_0 = arith.constant 0 : i32
    return %c0_i32, %arg1 : i32, i32
  }
  func.func @transform_3(%arg0: i32, %arg1: i32, %arg2: i32) -> (i32, i32) {
    %c0_i32 = arith.constant 0 : i32
    return %arg0, %arg1 : i32, i32
  }
}

module attributes {stable_mosaic.version = 11 : i64} {
  func.func @_ffn_add_ln_kernel(%arg0: i32, %arg1: i32, %arg2: memref<16x32xbf16, #tpu.memory_space<vmem>>, %arg3: memref<32x128xbf16, #tpu.memory_space<vmem>>, %arg4: memref<1x128xf32, #tpu.memory_space<vmem>>, %arg5: memref<128x32xbf16, #tpu.memory_space<vmem>>, %arg6: memref<1x32xf32, #tpu.memory_space<vmem>>, %arg7: memref<1x32xf32, #tpu.memory_space<vmem>>, %arg8: memref<1x32xf32, #tpu.memory_space<vmem>>, %arg9: memref<16x32xbf16, #tpu.memory_space<vmem>>, %arg10: memref<16x32xf32, #tpu.memory_space<vmem>>) attributes {dimension_semantics = [#tpu.dimension_semantics<parallel>, #tpu.dimension_semantics<arbitrary>], iteration_bounds = array<i64: 1, 1>, scalar_prefetch = 0 : i64, scratch_operands = 1 : i64, tpu.core_type = #tpu.core_type<tc>, window_params = [{transform_indices = @transform_0, window_bounds = array<i64: 16, 32>}, {transform_indices = @transform_1, window_bounds = array<i64: 32, 128>}, {transform_indices = @transform_2, window_bounds = array<i64: 1, 128>}, {transform_indices = @transform_3, window_bounds = array<i64: 128, 32>}, {pipeline_mode = #tpu.pipeline_mode<synchronous>, transform_indices = @transform_4, window_bounds = array<i64: 1, 32>}, {pipeline_mode = #tpu.pipeline_mode<synchronous>, transform_indices = @transform_5, window_bounds = array<i64: 1, 32>}, {pipeline_mode = #tpu.pipeline_mode<synchronous>, transform_indices = @transform_6, window_bounds = array<i64: 1, 32>}, {transform_indices = @transform_7, window_bounds = array<i64: 16, 32>}]} {
    %c0_i32 = arith.constant 0 : i32
    %0 = arith.cmpi eq, %arg1, %c0_i32 : i32
    %1 = arith.extui %0 : i1 to i32
    %c0_i32_0 = arith.constant 0 : i32
    %2 = arith.cmpi ne, %1, %c0_i32_0 : i32
    scf.if %2 {
      %cst_16 = arith.constant 0.000000e+00 : f32
      %20 = vector.broadcast %cst_16 : f32 to vector<16x32xf32>
      %c0_17 = arith.constant 0 : index
      %c0_18 = arith.constant 0 : index
      %21 = vector.load %arg10[%c0_17, %c0_18] : memref<16x32xf32, #tpu.memory_space<vmem>>, vector<16x32xf32>
      tpu.vector_store %arg10[%c0_17, %c0_18], %20 {strides = array<i32>} : memref<16x32xf32, #tpu.memory_space<vmem>>, vector<16x32xf32>,
    } else {
    }
    %c0 = arith.constant 0 : index
    %c0_1 = arith.constant 0 : index
    %3 = vector.load %arg2[%c0, %c0_1] : memref<16x32xbf16, #tpu.memory_space<vmem>>, vector<16x32xbf16>
    %c0_2 = arith.constant 0 : index
    %c0_3 = arith.constant 0 : index
    %4 = vector.load %arg3[%c0_2, %c0_3] : memref<32x128xbf16, #tpu.memory_space<vmem>>, vector<32x128xbf16>
    %cst = arith.constant dense<0.000000e+00> : vector<16x128xf32>
    %5 = tpu.matmul %3, %4, %cst {dimension_numbers = #tpu.dot_dimension_numbers<[1], [0], [0], [1], [0, 0, 1, 1], [], []>} : vector<16x32xbf16>, vector<32x128xbf16>, vector<16x128xf32> -> vector<16x128xf32>
    %c0_4 = arith.constant 0 : index
    %c0_5 = arith.constant 0 : index
    %6 = vector.load %arg4[%c0_4, %c0_5] : memref<1x128xf32, #tpu.memory_space<vmem>>, vector<1x128xf32>
    %7 = vector.broadcast %6 : vector<1x128xf32> to vector<16x128xf32>
    %8 = arith.addf %5, %7 : vector<16x128xf32>
    %cst_6 = arith.constant 0.000000e+00 : f32
    %9 = vector.broadcast %cst_6 : f32 to vector<16x128xf32>
    %10 = arith.maximumf %8, %9 : vector<16x128xf32>
    %11 = arith.truncf %10 : vector<16x128xf32> to vector<16x128xbf16>
    %c0_7 = arith.constant 0 : index
    %c0_8 = arith.constant 0 : index
    %12 = vector.load %arg10[%c0_7, %c0_8] : memref<16x32xf32, #tpu.memory_space<vmem>>, vector<16x32xf32>
    %c0_9 = arith.constant 0 : index
    %c0_10 = arith.constant 0 : index
    %13 = vector.load %arg5[%c0_9, %c0_10] : memref<128x32xbf16, #tpu.memory_space<vmem>>, vector<128x32xbf16>
    %cst_11 = arith.constant dense<0.000000e+00> : vector<16x32xf32>
    %14 = tpu.matmul %11, %13, %cst_11 {dimension_numbers = #tpu.dot_dimension_numbers<[1], [0], [0], [1], [0, 0, 1, 1], [], []>} : vector<16x128xbf16>, vector<128x32xbf16>, vector<16x32xf32> -> vector<16x32xf32>
    %15 = arith.addf %12, %14 : vector<16x32xf32>
    %c0_12 = arith.constant 0 : index
    %c0_13 = arith.constant 0 : index
    %16 = vector.load %arg10[%c0_12, %c0_13] : memref<16x32xf32, #tpu.memory_space<vmem>>, vector<16x32xf32>
    tpu.vector_store %arg10[%c0_12, %c0_13], %15 {strides = array<i32>} : memref<16x32xf32, #tpu.memory_space<vmem>>, vector<16x32xf32>,
    %c0_i32_14 = arith.constant 0 : i32
    %17 = arith.cmpi eq, %arg1, %c0_i32_14 : i32
    %18 = arith.extui %17 : i1 to i32
    %c0_i32_15 = arith.constant 0 : i32
    %19 = arith.cmpi ne, %18, %c0_i32_15 : i32
    scf.if %19 {
      %c0_16 = arith.constant 0 : index
      %c0_17 = arith.constant 0 : index
      %20 = vector.load %arg10[%c0_16, %c0_17] : memref<16x32xf32, #tpu.memory_space<vmem>>, vector<16x32xf32>
      %c0_18 = arith.constant 0 : index
      %c0_19 = arith.constant 0 : index
      %21 = vector.load %arg6[%c0_18, %c0_19] : memref<1x32xf32, #tpu.memory_space<vmem>>, vector<1x32xf32>
      %22 = vector.broadcast %21 : vector<1x32xf32> to vector<16x32xf32>
      %23 = arith.addf %20, %22 : vector<16x32xf32>
      %c0_20 = arith.constant 0 : index
      %c0_21 = arith.constant 0 : index
      %24 = vector.load %arg2[%c0_20, %c0_21] : memref<16x32xbf16, #tpu.memory_space<vmem>>, vector<16x32xbf16>
      %25 = arith.extf %24 : vector<16x32xbf16> to vector<16x32xf32>
      %26 = arith.addf %23, %25 : vector<16x32xf32>
      %cst_22 = arith.constant dense<0.000000e+00> : vector<16xf32>
      %27 = vector.multi_reduction <add>, %26, %cst_22 [1] : vector<16x32xf32> to vector<16xf32>
      %28 = vector.shape_cast %27 : vector<16xf32> to vector<16x1xf32>
      %cst_23 = arith.constant 3.200000e+01 : f32
      %29 = vector.broadcast %cst_23 : f32 to vector<16x1xf32>
      %30 = arith.divf %28, %29 : vector<16x1xf32>
      %31 = vector.broadcast %30 : vector<16x1xf32> to vector<16x32xf32>
      %32 = arith.subf %26, %31 : vector<16x32xf32>
      %33 = arith.mulf %32, %32 : vector<16x32xf32>
      %cst_24 = arith.constant dense<0.000000e+00> : vector<16xf32>
      %34 = vector.multi_reduction <add>, %33, %cst_24 [1] : vector<16x32xf32> to vector<16xf32>
      %35 = vector.shape_cast %34 : vector<16xf32> to vector<16x1xf32>
      %cst_25 = arith.constant 3.200000e+01 : f32
      %36 = vector.broadcast %cst_25 : f32 to vector<16x1xf32>
      %37 = arith.divf %35, %36 : vector<16x1xf32>
      %cst_26 = arith.constant 9.99999974E-6 : f32
      %38 = vector.broadcast %cst_26 : f32 to vector<16x1xf32>
      %39 = arith.addf %37, %38 : vector<16x1xf32>
      %40 = math.rsqrt %39 : vector<16x1xf32>
      %41 = vector.broadcast %40 : vector<16x1xf32> to vector<16x32xf32>
      %42 = arith.mulf %32, %41 : vector<16x32xf32>
      %c0_27 = arith.constant 0 : index
      %c0_28 = arith.constant 0 : index
      %43 = vector.load %arg7[%c0_27, %c0_28] : memref<1x32xf32, #tpu.memory_space<vmem>>, vector<1x32xf32>
      %44 = vector.broadcast %43 : vector<1x32xf32> to vector<16x32xf32>
      %45 = arith.mulf %42, %44 : vector<16x32xf32>
      %c0_29 = arith.constant 0 : index
      %c0_30 = arith.constant 0 : index
      %46 = vector.load %arg8[%c0_29, %c0_30] : memref<1x32xf32, #tpu.memory_space<vmem>>, vector<1x32xf32>
      %47 = vector.broadcast %46 : vector<1x32xf32> to vector<16x32xf32>
      %48 = arith.addf %45, %47 : vector<16x32xf32>
      %49 = arith.truncf %48 : vector<16x32xf32> to vector<16x32xbf16>
      %c0_31 = arith.constant 0 : index
      %c0_32 = arith.constant 0 : index
      %50 = vector.load %arg9[%c0_31, %c0_32] : memref<16x32xbf16, #tpu.memory_space<vmem>>, vector<16x32xbf16>
      tpu.vector_store %arg9[%c0_31, %c0_32], %49 {strides = array<i32>} : memref<16x32xbf16, #tpu.memory_space<vmem>>, vector<16x32xbf16>,
    } else {
    }
    return
  }
  func.func @transform_0(%arg0: i32, %arg1: i32) -> (i32, i32) {
    %c0_i32 = arith.constant 0 : i32
    %c0_i32_0 = arith.constant 0 : i32
    return %arg0, %c0_i32 : i32, i32
  }
  func.func @transform_1(%arg0: i32, %arg1: i32) -> (i32, i32) {
    %c0_i32 = arith.constant 0 : i32
    %c0_i32_0 = arith.constant 0 : i32
    return %c0_i32, %arg1 : i32, i32
  }
  func.func @transform_2(%arg0: i32, %arg1: i32) -> (i32, i32) {
    %c0_i32 = arith.constant 0 : i32
    %c0_i32_0 = arith.constant 0 : i32
    return %c0_i32, %arg1 : i32, i32
  }
  func.func @transform_3(%arg0: i32, %arg1: i32) -> (i32, i32) {
    %c0_i32 = arith.constant 0 : i32
    %c0_i32_0 = arith.constant 0 : i32
    return %arg1, %c0_i32 : i32, i32
  }
  func.func @transform_4(%arg0: i32, %arg1: i32) -> (i32, i32) {
    %c0_i32 = arith.constant 0 : i32
    %c0_i32_0 = arith.constant 0 : i32
    %c0_i32_1 = arith.constant 0 : i32
    return %c0_i32, %c0_i32_0 : i32, i32
  }
  func.func @transform_5(%arg0: i32, %arg1: i32) -> (i32, i32) {
    %c0_i32 = arith.constant 0 : i32
    %c0_i32_0 = arith.constant 0 : i32
    %c0_i32_1 = arith.constant 0 : i32
    return %c0_i32, %c0_i32_0 : i32, i32
  }
  func.func @transform_6(%arg0: i32, %arg1: i32) -> (i32, i32) {
    %c0_i32 = arith.constant 0 : i32
    %c0_i32_0 = arith.constant 0 : i32
    %c0_i32_1 = arith.constant 0 : i32
    return %c0_i32, %c0_i32_0 : i32, i32
  }
  func.func @transform_7(%arg0: i32, %arg1: i32) -> (i32, i32) {
    %c0_i32 = arith.constant 0 : i32
    %c0_i32_0 = arith.constant 0 : i32
    return %arg0, %c0_i32 : i32, i32
  }
}

module attributes {stable_mosaic.version = 11 : i64} {
  func.func @_flash_mha_kernel(%arg0: i32, %arg1: i32, %arg2: i32, %arg3: i32, %arg4: memref<1x1x1x8x8xbf16, #tpu.memory_space<vmem>>, %arg5: memref<1x1x1x8x8xbf16, #tpu.memory_space<vmem>>, %arg6: memref<1x1x1x8x8xbf16, #tpu.memory_space<vmem>>, %arg7: memref<1x1x8xf32, #tpu.memory_space<vmem>>, %arg8: memref<1x1x8x8xbf16, #tpu.memory_space<vmem>>, %arg9: memref<8x1xf32, #tpu.memory_space<vmem>>, %arg10: memref<8x1xf32, #tpu.memory_space<vmem>>, %arg11: memref<8x8xf32, #tpu.memory_space<vmem>>) attributes {dimension_semantics = [#tpu.dimension_semantics<parallel>, #tpu.dimension_semantics<parallel>, #tpu.dimension_semantics<parallel>, #tpu.dimension_semantics<arbitrary>], iteration_bounds = array<i64: 2, 4, 1, 1>, scalar_prefetch = 0 : i64, scratch_operands = 3 : i64, tpu.core_type = #tpu.core_type<tc>, window_params = [{transform_indices = @transform_0, window_bounds = array<i64: 1, 1, 1, 8, 8>}, {transform_indices = @transform_1, window_bounds = array<i64: 1, 1, 1, 8, 8>}, {transform_indices = @transform_2, window_bounds = array<i64: 1, 1, 1, 8, 8>}, {transform_indices = @transform_3, window_bounds = array<i64: 1, 1, 8>}, {transform_indices = @transform_4, window_bounds = array<i64: 1, 1, 8, 8>}]} {
    %c0_i32 = arith.constant 0 : i32
    %0 = arith.cmpi eq, %arg3, %c0_i32 : i32
    %1 = arith.extui %0 : i1 to i32
    %c0_i32_0 = arith.constant 0 : i32
    %2 = arith.cmpi ne, %1, %c0_i32_0 : i32
    scf.if %2 {
      %cst_35 = arith.constant -1.000000e+30 : f32
      %40 = vector.broadcast %cst_35 : f32 to vector<8x1xf32>
      %c0_36 = arith.constant 0 : index
      %c0_37 = arith.constant 0 : index
      %41 = vector.load %arg9[%c0_36, %c0_37] : memref<8x1xf32, #tpu.memory_space<vmem>>, vector<8x1xf32>
      tpu.vector_store %arg9[%c0_36, %c0_37], %40 {strides = array<i32>} : memref<8x1xf32, #tpu.memory_space<vmem>>, vector<8x1xf32>,
      %cst_38 = arith.constant 0.000000e+00 : f32
      %42 = vector.broadcast %cst_38 : f32 to vector<8x1xf32>
      %c0_39 = arith.constant 0 : index
      %c0_40 = arith.constant 0 : index
      %43 = vector.load %arg10[%c0_39, %c0_40] : memref<8x1xf32, #tpu.memory_space<vmem>>, vector<8x1xf32>
      tpu.vector_store %arg10[%c0_39, %c0_40], %42 {strides = array<i32>} : memref<8x1xf32, #tpu.memory_space<vmem>>, vector<8x1xf32>,
      %cst_41 = arith.constant 0.000000e+00 : f32
      %44 = vector.broadcast %cst_41 : f32 to vector<8x8xf32>
      %c0_42 = arith.constant 0 : index
      %c0_43 = arith.constant 0 : index
      %45 = vector.load %arg11[%c0_42, %c0_43] : memref<8x8xf32, #tpu.memory_space<vmem>>, vector<8x8xf32>
      tpu.vector_store %arg11[%c0_42, %c0_43], %44 {strides = array<i32>} : memref<8x8xf32, #tpu.memory_space<vmem>>, vector<8x8xf32>,
    } else {
    }
    %c0 = arith.constant 0 : index
    %c0_1 = arith.constant 0 : index
    %c0_2 = arith.constant 0 : index
    %c0_3 = arith.constant 0 : index
    %c0_4 = arith.constant 0 : index
    %3 = vector.load %arg4[%c0, %c0_1, %c0_2, %c0_3, %c0_4] : memref<1x1x1x8x8xbf16, #tpu.memory_space<vmem>>, vector<1x1x1x8x8xbf16>
    %4 = vector.shape_cast %3 : vector<1x1x1x8x8xbf16> to vector<8x8xbf16>
    %c0_5 = arith.constant 0 : index
    %c0_6 = arith.constant 0 : index
    %c0_7 = arith.constant 0 : index
    %c0_8 = arith.constant 0 : index
    %c0_9 = arith.constant 0 : index
    %5 = vector.load %arg5[%c0_5, %c0_6, %c0_7, %c0_8, %c0_9] : memref<1x1x1x8x8xbf16, #tpu.memory_space<vmem>>, vector<1x1x1x8x8xbf16>
    %6 = vector.shape_cast %5 : vector<1x1x1x8x8xbf16> to vector<8x8xbf16>
    %cst = arith.constant dense<0.000000e+00> : vector<8x8xf32>
    %7 = tpu.matmul %4, %6, %cst {dimension_numbers = #tpu.dot_dimension_numbers<[1], [1], [0], [0], [0, 0, 1, 0], [], []>} : vector<8x8xbf16>, vector<8x8xbf16>, vector<8x8xf32> -> vector<8x8xf32>
    %c0_10 = arith.constant 0 : index
    %c0_11 = arith.constant 0 : index
    %c0_12 = arith.constant 0 : index
    %8 = vector.load %arg7[%c0_10, %c0_11, %c0_12] : memref<1x1x8xf32, #tpu.memory_space<vmem>>, vector<1x1x8xf32>
    %9 = vector.shape_cast %8 : vector<1x1x8xf32> to vector<1x8xf32>
    %10 = vector.broadcast %9 : vector<1x8xf32> to vector<8x8xf32>
    %11 = arith.addf %7, %10 : vector<8x8xf32>
    %c0_13 = arith.constant 0 : index
    %c0_14 = arith.constant 0 : index
    %12 = vector.load %arg9[%c0_13, %c0_14] : memref<8x1xf32, #tpu.memory_space<vmem>>, vector<8x1xf32>
    %cst_15 = arith.constant dense<0xFF800000> : vector<8xf32>
    %13 = vector.multi_reduction <maximumf>, %11, %cst_15 [1] : vector<8x8xf32> to vector<8xf32>
    %14 = vector.shape_cast %13 : vector<8xf32> to vector<8x1xf32>
    %15 = arith.maximumf %12, %14 : vector<8x1xf32>
    %16 = arith.subf %12, %15 : vector<8x1xf32>
    %17 = math.exp %16 : vector<8x1xf32>
    %18 = vector.broadcast %15 : vector<8x1xf32> to vector<8x8xf32>
    %19 = arith.subf %11, %18 : vector<8x8xf32>
    %20 = math.exp %19 : vector<8x8xf32>
    %c0_16 = arith.constant 0 : index
    %c0_17 = arith.constant 0 : index
    %21 = vector.load %arg10[%c0_16, %c0_17] : memref<8x1xf32, #tpu.memory_space<vmem>>, vector<8x1xf32>
    %22 = arith.mulf %17, %21 : vector<8x1xf32>
    %cst_18 = arith.constant dense<0.000000e+00> : vector<8xf32>
    %23 = vector.multi_reduction <add>, %20, %cst_18 [1] : vector<8x8xf32> to vector<8xf32>
    %24 = vector.shape_cast %23 : vector<8xf32> to vector<8x1xf32>
    %25 = arith.addf %22, %24 : vector<8x1xf32>
    %c0_19 = arith.constant 0 : index
    %c0_20 = arith.constant 0 : index
    %26 = vector.load %arg10[%c0_19, %c0_20] : memref<8x1xf32, #tpu.memory_space<vmem>>, vector<8x1xf32>
    tpu.vector_store %arg10[%c0_19, %c0_20], %25 {strides = array<i32>} : memref<8x1xf32, #tpu.memory_space<vmem>>, vector<8x1xf32>,
    %c0_21 = arith.constant 0 : index
    %c0_22 = arith.constant 0 : index
    %27 = vector.load %arg11[%c0_21, %c0_22] : memref<8x8xf32, #tpu.memory_space<vmem>>, vector<8x8xf32>
    %28 = vector.broadcast %17 : vector<8x1xf32> to vector<8x8xf32>
    %29 = arith.mulf %28, %27 : vector<8x8xf32>
    %30 = arith.truncf %20 : vector<8x8xf32> to vector<8x8xbf16>
    %c0_23 = arith.constant 0 : index
    %c0_24 = arith.constant 0 : index
    %c0_25 = arith.constant 0 : index
    %c0_26 = arith.constant 0 : index
    %c0_27 = arith.constant 0 : index
    %31 = vector.load %arg6[%c0_23, %c0_24, %c0_25, %c0_26, %c0_27] : memref<1x1x1x8x8xbf16, #tpu.memory_space<vmem>>, vector<1x1x1x8x8xbf16>
    %32 = vector.shape_cast %31 : vector<1x1x1x8x8xbf16> to vector<8x8xbf16>
    %cst_28 = arith.constant dense<0.000000e+00> : vector<8x8xf32>
    %33 = tpu.matmul %30, %32, %cst_28 {dimension_numbers = #tpu.dot_dimension_numbers<[1], [0], [0], [1], [0, 0, 1, 1], [], []>} : vector<8x8xbf16>, vector<8x8xbf16>, vector<8x8xf32> -> vector<8x8xf32>
    %34 = arith.addf %29, %33 : vector<8x8xf32>
    %c0_29 = arith.constant 0 : index
    %c0_30 = arith.constant 0 : index
    %35 = vector.load %arg11[%c0_29, %c0_30] : memref<8x8xf32, #tpu.memory_space<vmem>>, vector<8x8xf32>
    tpu.vector_store %arg11[%c0_29, %c0_30], %34 {strides = array<i32>} : memref<8x8xf32, #tpu.memory_space<vmem>>, vector<8x8xf32>,
    %c0_31 = arith.constant 0 : index
    %c0_32 = arith.constant 0 : index
    %36 = vector.load %arg9[%c0_31, %c0_32] : memref<8x1xf32, #tpu.memory_space<vmem>>, vector<8x1xf32>
    tpu.vector_store %arg9[%c0_31, %c0_32], %15 {strides = array<i32>} : memref<8x1xf32, #tpu.memory_space<vmem>>, vector<8x1xf32>,
    %c0_i32_33 = arith.constant 0 : i32
    %37 = arith.cmpi eq, %arg3, %c0_i32_33 : i32
    %38 = arith.extui %37 : i1 to i32
    %c0_i32_34 = arith.constant 0 : i32
    %39 = arith.cmpi ne, %38, %c0_i32_34 : i32
    scf.if %39 {
      %c0_35 = arith.constant 0 : index
      %c0_36 = arith.constant 0 : index
      %40 = vector.load %arg11[%c0_35, %c0_36] : memref<8x8xf32, #tpu.memory_space<vmem>>, vector<8x8xf32>
      %c0_37 = arith.constant 0 : index
      %c0_38 = arith.constant 0 : index
      %41 = vector.load %arg10[%c0_37, %c0_38] : memref<8x1xf32, #tpu.memory_space<vmem>>, vector<8x1xf32>
      %42 = tpu.reciprocal %41 {approx = true} : vector<8x1xf32> -> vector<8x1xf32>
      %43 = vector.broadcast %42 : vector<8x1xf32> to vector<8x8xf32>
      %44 = arith.mulf %40, %43 : vector<8x8xf32>
      %45 = arith.truncf %44 : vector<8x8xf32> to vector<8x8xbf16>
      %c0_39 = arith.constant 0 : index
      %c0_40 = arith.constant 0 : index
      %c0_41 = arith.constant 0 : index
      %c0_42 = arith.constant 0 : index
      %46 = vector.load %arg8[%c0_39, %c0_40, %c0_41, %c0_42] : memref<1x1x8x8xbf16, #tpu.memory_space<vmem>>, vector<1x1x8x8xbf16>
      %47 = vector.shape_cast %46 : vector<1x1x8x8xbf16> to vector<8x8xbf16>
      %48 = vector.shape_cast %45 : vector<8x8xbf16> to vector<1x1x8x8xbf16>
      tpu.vector_store %arg8[%c0_39, %c0_40, %c0_41, %c0_42], %48 {strides = array<i32>} : memref<1x1x8x8xbf16, #tpu.memory_space<vmem>>, vector<1x1x8x8xbf16>,
    } else {
    }
    return
  }
  func.func @transform_0(%arg0: i32, %arg1: i32, %arg2: i32, %arg3: i32) -> (i32, i32, i32, i32, i32) {
    %c0_i32 = arith.constant 0 : i32
    %c0_i32_0 = arith.constant 0 : i32
    %c0_i32_1 = arith.constant 0 : i32
    return %c0_i32, %arg0, %arg1, %arg2, %c0_i32_0 : i32, i32, i32, i32, i32
  }
  func.func @transform_1(%arg0: i32, %arg1: i32, %arg2: i32, %arg3: i32) -> (i32, i32, i32, i32, i32) {
    %c1_i32 = arith.constant 1 : i32
    %c0_i32 = arith.constant 0 : i32
    %c0_i32_0 = arith.constant 0 : i32
    return %c1_i32, %arg0, %arg1, %arg3, %c0_i32 : i32, i32, i32, i32, i32
  }
  func.func @transform_2(%arg0: i32, %arg1: i32, %arg2: i32, %arg3: i32) -> (i32, i32, i32, i32, i32) {
    %c2_i32 = arith.constant 2 : i32
    %c0_i32 = arith.constant 0 : i32
    %c0_i32_0 = arith.constant 0 : i32
    return %c2_i32, %arg0, %arg1, %arg3, %c0_i32 : i32, i32, i32, i32, i32
  }
  func.func @transform_3(%arg0: i32, %arg1: i32, %arg2: i32, %arg3: i32) -> (i32, i32, i32) {
    %c0_i32 = arith.constant 0 : i32
    %c0_i32_0 = arith.constant 0 : i32
    return %arg0, %c0_i32, %arg3 : i32, i32, i32
  }
  func.func @transform_4(%arg0: i32, %arg1: i32, %arg2: i32, %arg3: i32) -> (i32, i32, i32, i32) {
    %c0_i32 = arith.constant 0 : i32
    %c0_i32_0 = arith.constant 0 : i32
    return %arg0, %arg1, %arg2, %c0_i32 : i32, i32, i32, i32
  }
}

module attributes {stable_mosaic.version = 11 : i64} {
  func.func @_flash_mha_kernel(%arg0: i32, %arg1: i32, %arg2: i32, %arg3: i32, %arg4: memref<1x1x1x8x8xbf16, #tpu.memory_space<vmem>>, %arg5: memref<1x1x1x8x8xbf16, #tpu.memory_space<vmem>>, %arg6: memref<1x1x1x8x8xbf16, #tpu.memory_space<vmem>>, %arg7: memref<1x1x8xf32, #tpu.memory_space<vmem>>, %arg8: memref<1x1x8x8xbf16, #tpu.memory_space<vmem>>, %arg9: memref<8x1xf32, #tpu.memory_space<vmem>>, %arg10: memref<8x1xf32, #tpu.memory_space<vmem>>, %arg11: memref<8x8xf32, #tpu.memory_space<vmem>>) attributes {dimension_semantics = [#tpu.dimension_semantics<parallel>, #tpu.dimension_semantics<parallel>, #tpu.dimension_semantics<parallel>, #tpu.dimension_semantics<arbitrary>], iteration_bounds = array<i64: 2, 4, 1, 1>, scalar_prefetch = 0 : i64, scratch_operands = 3 : i64, tpu.core_type = #tpu.core_type<tc>, window_params = [{transform_indices = @transform_0, window_bounds = array<i64: 1, 1, 1, 8, 8>}, {transform_indices = @transform_1, window_bounds = array<i64: 1, 1, 1, 8, 8>}, {transform_indices = @transform_2, window_bounds = array<i64: 1, 1, 1, 8, 8>}, {transform_indices = @transform_3, window_bounds = array<i64: 1, 1, 8>}, {transform_indices = @transform_4, window_bounds = array<i64: 1, 1, 8, 8>}]} {
    %c0_i32 = arith.constant 0 : i32
    %0 = arith.cmpi eq, %arg3, %c0_i32 : i32
    %1 = arith.extui %0 : i1 to i32
    %c0_i32_0 = arith.constant 0 : i32
    %2 = arith.cmpi ne, %1, %c0_i32_0 : i32
    scf.if %2 {
      %cst_35 = arith.constant -1.000000e+30 : f32
      %40 = vector.broadcast %cst_35 : f32 to vector<8x1xf32>
      %c0_36 = arith.constant 0 : index
      %c0_37 = arith.constant 0 : index
      %41 = vector.load %arg9[%c0_36, %c0_37] : memref<8x1xf32, #tpu.memory_space<vmem>>, vector<8x1xf32>
      tpu.vector_store %arg9[%c0_36, %c0_37], %40 {strides = array<i32>} : memref<8x1xf32, #tpu.memory_space<vmem>>, vector<8x1xf32>,
      %cst_38 = arith.constant 0.000000e+00 : f32
      %42 = vector.broadcast %cst_38 : f32 to vector<8x1xf32>
      %c0_39 = arith.constant 0 : index
      %c0_40 = arith.constant 0 : index
      %43 = vector.load %arg10[%c0_39, %c0_40] : memref<8x1xf32, #tpu.memory_space<vmem>>, vector<8x1xf32>
      tpu.vector_store %arg10[%c0_39, %c0_40], %42 {strides = array<i32>} : memref<8x1xf32, #tpu.memory_space<vmem>>, vector<8x1xf32>,
      %cst_41 = arith.constant 0.000000e+00 : f32
      %44 = vector.broadcast %cst_41 : f32 to vector<8x8xf32>
      %c0_42 = arith.constant 0 : index
      %c0_43 = arith.constant 0 : index
      %45 = vector.load %arg11[%c0_42, %c0_43] : memref<8x8xf32, #tpu.memory_space<vmem>>, vector<8x8xf32>
      tpu.vector_store %arg11[%c0_42, %c0_43], %44 {strides = array<i32>} : memref<8x8xf32, #tpu.memory_space<vmem>>, vector<8x8xf32>,
    } else {
    }
    %c0 = arith.constant 0 : index
    %c0_1 = arith.constant 0 : index
    %c0_2 = arith.constant 0 : index
    %c0_3 = arith.constant 0 : index
    %c0_4 = arith.constant 0 : index
    %3 = vector.load %arg4[%c0, %c0_1, %c0_2, %c0_3, %c0_4] : memref<1x1x1x8x8xbf16, #tpu.memory_space<vmem>>, vector<1x1x1x8x8xbf16>
    %4 = vector.shape_cast %3 : vector<1x1x1x8x8xbf16> to vector<8x8xbf16>
    %c0_5 = arith.constant 0 : index
    %c0_6 = arith.constant 0 : index
    %c0_7 = arith.constant 0 : index
    %c0_8 = arith.constant 0 : index
    %c0_9 = arith.constant 0 : index
    %5 = vector.load %arg5[%c0_5, %c0_6, %c0_7, %c0_8, %c0_9] : memref<1x1x1x8x8xbf16, #tpu.memory_space<vmem>>, vector<1x1x1x8x8xbf16>
    %6 = vector.shape_cast %5 : vector<1x1x1x8x8xbf16> to vector<8x8xbf16>
    %cst = arith.constant dense<0.000000e+00> : vector<8x8xf32>
    %7 = tpu.matmul %4, %6, %cst {dimension_numbers = #tpu.dot_dimension_numbers<[1], [1], [0], [0], [0, 0, 1, 0], [], []>} : vector<8x8xbf16>, vector<8x8xbf16>, vector<8x8xf32> -> vector<8x8xf32>
    %c0_10 = arith.constant 0 : index
    %c0_11 = arith.constant 0 : index
    %c0_12 = arith.constant 0 : index
    %8 = vector.load %arg7[%c0_10, %c0_11, %c0_12] : memref<1x1x8xf32, #tpu.memory_space<vmem>>, vector<1x1x8xf32>
    %9 = vector.shape_cast %8 : vector<1x1x8xf32> to vector<1x8xf32>
    %10 = vector.broadcast %9 : vector<1x8xf32> to vector<8x8xf32>
    %11 = arith.addf %7, %10 : vector<8x8xf32>
    %c0_13 = arith.constant 0 : index
    %c0_14 = arith.constant 0 : index
    %12 = vector.load %arg9[%c0_13, %c0_14] : memref<8x1xf32, #tpu.memory_space<vmem>>, vector<8x1xf32>
    %cst_15 = arith.constant dense<0xFF800000> : vector<8xf32>
    %13 = vector.multi_reduction <maximumf>, %11, %cst_15 [1] : vector<8x8xf32> to vector<8xf32>
    %14 = vector.shape_cast %13 : vector<8xf32> to vector<8x1xf32>
    %15 = arith.maximumf %12, %14 : vector<8x1xf32>
    %16 = arith.subf %12, %15 : vector<8x1xf32>
    %17 = math.exp %16 : vector<8x1xf32>
    %18 = vector.broadcast %15 : vector<8x1xf32> to vector<8x8xf32>
    %19 = arith.subf %11, %18 : vector<8x8xf32>
    %20 = math.exp %19 : vector<8x8xf32>
    %c0_16 = arith.constant 0 : index
    %c0_17 = arith.constant 0 : index
    %21 = vector.load %arg10[%c0_16, %c0_17] : memref<8x1xf32, #tpu.memory_space<vmem>>, vector<8x1xf32>
    %22 = arith.mulf %17, %21 : vector<8x1xf32>
    %cst_18 = arith.constant dense<0.000000e+00> : vector<8xf32>
    %23 = vector.multi_reduction <add>, %20, %cst_18 [1] : vector<8x8xf32> to vector<8xf32>
    %24 = vector.shape_cast %23 : vector<8xf32> to vector<8x1xf32>
    %25 = arith.addf %22, %24 : vector<8x1xf32>
    %c0_19 = arith.constant 0 : index
    %c0_20 = arith.constant 0 : index
    %26 = vector.load %arg10[%c0_19, %c0_20] : memref<8x1xf32, #tpu.memory_space<vmem>>, vector<8x1xf32>
    tpu.vector_store %arg10[%c0_19, %c0_20], %25 {strides = array<i32>} : memref<8x1xf32, #tpu.memory_space<vmem>>, vector<8x1xf32>,
    %c0_21 = arith.constant 0 : index
    %c0_22 = arith.constant 0 : index
    %27 = vector.load %arg11[%c0_21, %c0_22] : memref<8x8xf32, #tpu.memory_space<vmem>>, vector<8x8xf32>
    %28 = vector.broadcast %17 : vector<8x1xf32> to vector<8x8xf32>
    %29 = arith.mulf %28, %27 : vector<8x8xf32>
    %30 = arith.truncf %20 : vector<8x8xf32> to vector<8x8xbf16>
    %c0_23 = arith.constant 0 : index
    %c0_24 = arith.constant 0 : index
    %c0_25 = arith.constant 0 : index
    %c0_26 = arith.constant 0 : index
    %c0_27 = arith.constant 0 : index
    %31 = vector.load %arg6[%c0_23, %c0_24, %c0_25, %c0_26, %c0_27] : memref<1x1x1x8x8xbf16, #tpu.memory_space<vmem>>, vector<1x1x1x8x8xbf16>
    %32 = vector.shape_cast %31 : vector<1x1x1x8x8xbf16> to vector<8x8xbf16>
    %cst_28 = arith.constant dense<0.000000e+00> : vector<8x8xf32>
    %33 = tpu.matmul %30, %32, %cst_28 {dimension_numbers = #tpu.dot_dimension_numbers<[1], [0], [0], [1], [0, 0, 1, 1], [], []>} : vector<8x8xbf16>, vector<8x8xbf16>, vector<8x8xf32> -> vector<8x8xf32>
    %34 = arith.addf %29, %33 : vector<8x8xf32>
    %c0_29 = arith.constant 0 : index
    %c0_30 = arith.constant 0 : index
    %35 = vector.load %arg11[%c0_29, %c0_30] : memref<8x8xf32, #tpu.memory_space<vmem>>, vector<8x8xf32>
    tpu.vector_store %arg11[%c0_29, %c0_30], %34 {strides = array<i32>} : memref<8x8xf32, #tpu.memory_space<vmem>>, vector<8x8xf32>,
    %c0_31 = arith.constant 0 : index
    %c0_32 = arith.constant 0 : index
    %36 = vector.load %arg9[%c0_31, %c0_32] : memref<8x1xf32, #tpu.memory_space<vmem>>, vector<8x1xf32>
    tpu.vector_store %arg9[%c0_31, %c0_32], %15 {strides = array<i32>} : memref<8x1xf32, #tpu.memory_space<vmem>>, vector<8x1xf32>,
    %c0_i32_33 = arith.constant 0 : i32
    %37 = arith.cmpi eq, %arg3, %c0_i32_33 : i32
    %38 = arith.extui %37 : i1 to i32
    %c0_i32_34 = arith.constant 0 : i32
    %39 = arith.cmpi ne, %38, %c0_i32_34 : i32
    scf.if %39 {
      %c0_35 = arith.constant 0 : index
      %c0_36 = arith.constant 0 : index
      %40 = vector.load %arg11[%c0_35, %c0_36] : memref<8x8xf32, #tpu.memory_space<vmem>>, vector<8x8xf32>
      %c0_37 = arith.constant 0 : index
      %c0_38 = arith.constant 0 : index
      %41 = vector.load %arg10[%c0_37, %c0_38] : memref<8x1xf32, #tpu.memory_space<vmem>>, vector<8x1xf32>
      %42 = tpu.reciprocal %41 {approx = true} : vector<8x1xf32> -> vector<8x1xf32>
      %43 = vector.broadcast %42 : vector<8x1xf32> to vector<8x8xf32>
      %44 = arith.mulf %40, %43 : vector<8x8xf32>
      %45 = arith.truncf %44 : vector<8x8xf32> to vector<8x8xbf16>
      %c0_39 = arith.constant 0 : index
      %c0_40 = arith.constant 0 : index
      %c0_41 = arith.constant 0 : index
      %c0_42 = arith.constant 0 : index
      %46 = vector.load %arg8[%c0_39, %c0_40, %c0_41, %c0_42] : memref<1x1x8x8xbf16, #tpu.memory_space<vmem>>, vector<1x1x8x8xbf16>
      %47 = vector.shape_cast %46 : vector<1x1x8x8xbf16> to vector<8x8xbf16>
      %48 = vector.shape_cast %45 : vector<8x8xbf16> to vector<1x1x8x8xbf16>
      tpu.vector_store %arg8[%c0_39, %c0_40, %c0_41, %c0_42], %48 {strides = array<i32>} : memref<1x1x8x8xbf16, #tpu.memory_space<vmem>>, vector<1x1x8x8xbf16>,
    } else {
    }
    return
  }
  func.func @transform_0(%arg0: i32, %arg1: i32, %arg2: i32, %arg3: i32) -> (i32, i32, i32, i32, i32) {
    %c0_i32 = arith.constant 0 : i32
    %c0_i32_0 = arith.constant 0 : i32
    %c0_i32_1 = arith.constant 0 : i32
    return %c0_i32, %arg0, %arg1, %arg2, %c0_i32_0 : i32, i32, i32, i32, i32
  }
  func.func @transform_1(%arg0: i32, %arg1: i32, %arg2: i32, %arg3: i32) -> (i32, i32, i32, i32, i32) {
    %c0_i32 = arith.constant 0 : i32
    %c0_i32_0 = arith.constant 0 : i32
    %c0_i32_1 = arith.constant 0 : i32
    return %c0_i32, %arg0, %arg1, %arg3, %c0_i32_0 : i32, i32, i32, i32, i32
  }
  func.func @transform_2(%arg0: i32, %arg1: i32, %arg2: i32, %arg3: i32) -> (i32, i32, i32, i32, i32) {
    %c1_i32 = arith.constant 1 : i32
    %c0_i32 = arith.constant 0 : i32
    %c0_i32_0 = arith.constant 0 : i32
    return %c1_i32, %arg0, %arg1, %arg3, %c0_i32 : i32, i32, i32, i32, i32
  }
  func.func @transform_3(%arg0: i32, %arg1: i32, %arg2: i32, %arg3: i32) -> (i32, i32, i32) {
    %c0_i32 = arith.constant 0 : i32
    %c0_i32_0 = arith.constant 0 : i32
    return %arg0, %c0_i32, %arg3 : i32, i32, i32
  }
  func.func @transform_4(%arg0: i32, %arg1: i32, %arg2: i32, %arg3: i32) -> (i32, i32, i32, i32) {
    %c0_i32 = arith.constant 0 : i32
    %c0_i32_0 = arith.constant 0 : i32
    return %arg0, %arg1, %arg2, %c0_i32 : i32, i32, i32, i32
  }
}

module attributes {stable_mosaic.version = 11 : i64} {
  func.func @_matmul_kernel(%arg0: i32, %arg1: i32, %arg2: i32, %arg3: memref<16x32xbf16, #tpu.memory_space<vmem>>, %arg4: memref<32x128xbf16, #tpu.memory_space<vmem>>, %arg5: memref<16x128xf32, #tpu.memory_space<vmem>>, %arg6: memref<16x128xf32, #tpu.memory_space<vmem>>) attributes {dimension_semantics = [#tpu.dimension_semantics<parallel>, #tpu.dimension_semantics<parallel>, #tpu.dimension_semantics<arbitrary>], iteration_bounds = array<i64: 1, 1, 1>, scalar_prefetch = 0 : i64, scratch_operands = 1 : i64, tpu.core_type = #tpu.core_type<tc>, window_params = [{transform_indices = @transform_0, window_bounds = array<i64: 16, 32>}, {transform_indices = @transform_1, window_bounds = array<i64: 32, 128>}, {transform_indices = @transform_2, window_bounds = array<i64: 16, 128>}]} {
    %c0_i32 = arith.constant 0 : i32
    %0 = arith.cmpi eq, %arg2, %c0_i32 : i32
    %1 = arith.extui %0 : i1 to i32
    %c0_i32_0 = arith.constant 0 : i32
    %2 = arith.cmpi ne, %1, %c0_i32_0 : i32
    scf.if %2 {
      %cst_10 = arith.constant 0.000000e+00 : f32
      %12 = vector.broadcast %cst_10 : f32 to vector<16x128xf32>
      %c0_11 = arith.constant 0 : index
      %c0_12 = arith.constant 0 : index
      %13 = vector.load %arg6[%c0_11, %c0_12] : memref<16x128xf32, #tpu.memory_space<vmem>>, vector<16x128xf32>
      tpu.vector_store %arg6[%c0_11, %c0_12], %12 {strides = array<i32>} : memref<16x128xf32, #tpu.memory_space<vmem>>, vector<16x128xf32>,
    } else {
    }
    %c0 = arith.constant 0 : index
    %c0_1 = arith.constant 0 : index
    %3 = vector.load %arg6[%c0, %c0_1] : memref<16x128xf32, #tpu.memory_space<vmem>>, vector<16x128xf32>
    %c0_2 = arith.constant 0 : index
    %c0_3 = arith.constant 0 : index
    %4 = vector.load %arg3[%c0_2, %c0_3] : memref<16x32xbf16, #tpu.memory_space<vmem>>, vector<16x32xbf16>
    %c0_4 = arith.constant 0 : index
    %c0_5 = arith.constant 0 : index
    %5 = vector.load %arg4[%c0_4, %c0_5] : memref<32x128xbf16, #tpu.memory_space<vmem>>, vector<32x128xbf16>
    %cst = arith.constant dense<0.000000e+00> : vector<16x128xf32>
    %6 = tpu.matmul %4, %5, %cst {dimension_numbers = #tpu.dot_dimension_numbers<[1], [0], [0], [1], [0, 0, 1, 1], [], []>} : vector<16x32xbf16>, vector<32x128xbf16>, vector<16x128xf32> -> vector<16x128xf32>
    %7 = arith.addf %3, %6 : vector<16x128xf32>
    %c0_6 = arith.constant 0 : index
    %c0_7 = arith.constant 0 : index
    %8 = vector.load %arg6[%c0_6, %c0_7] : memref<16x128xf32, #tpu.memory_space<vmem>>, vector<16x128xf32>
    tpu.vector_store %arg6[%c0_6, %c0_7], %7 {strides = array<i32>} : memref<16x128xf32, #tpu.memory_space<vmem>>, vector<16x128xf32>,
    %c0_i32_8 = arith.constant 0 : i32
    %9 = arith.cmpi eq, %arg2, %c0_i32_8 : i32
    %10 = arith.extui %9 : i1 to i32
    %c0_i32_9 = arith.constant 0 : i32
    %11 = arith.cmpi ne, %10, %c0_i32_9 : i32
    scf.if %11 {
      %c0_10 = arith.constant 0 : index
      %c0_11 = arith.constant 0 : index
      %12 = vector.load %arg6[%c0_10, %c0_11] : memref<16x128xf32, #tpu.memory_space<vmem>>, vector<16x128xf32>
      %c0_12 = arith.constant 0 : index
      %c0_13 = arith.constant 0 : index
      %13 = vector.load %arg5[%c0_12, %c0_13] : memref<16x128xf32, #tpu.memory_space<vmem>>, vector<16x128xf32>
      tpu.vector_store %arg5[%c0_12, %c0_13], %12 {strides = array<i32>} : memref<16x128xf32, #tpu.memory_space<vmem>>, vector<16x128xf32>,
    } else {
    }
    return
  }
  func.func @transform_0(%arg0: i32, %arg1: i32, %arg2: i32) -> (i32, i32) {
    %c0_i32 = arith.constant 0 : i32
    return %arg0, %arg2 : i32, i32
  }
  func.func @transform_1(%arg0: i32, %arg1: i32, %arg2: i32) -> (i32, i32) {
    %c0_i32 = arith.constant 0 : i32
    return %arg2, %arg1 : i32, i32
  }
  func.func @transform_2(%arg0: i32, %arg1: i32, %arg2: i32) -> (i32, i32) {
    %c0_i32 = arith.constant 0 : i32
    return %arg0, %arg1 : i32, i32
  }
}

</mosaic_0001>

<bundles_post_ra>
// kernel: transformer_forward.35
= control target key start
LH: loop header
LB: loop body
LE: loop exit
PB: predicated region body
PF: predicated region fallthrough
CT: control target
= control target key end

     0   :  { %vm28_vm0 = vcmask 261120   ;;  %v220_v0 = vmov 0.0   ;;  %vm221_vm1 = vmmov 0   ;;  %vm178_vm2 = vcmask 257024   ;;  %s293_s1 = inlined_call_operand.vmem [shape: bf16[32,32], index: 1, kind: input, shape index: {}]   ;;  %s294_s0 = inlined_call_operand.vmem [shape: bf16[16,32], index: 0, kind: input, shape index: {}]   ;;  %s295_s3 = inlined_call_operand.vmem [shape: bf16[16,32], index: 3, kind: input, shape index: {}]   ;;  %s296_s2 = inlined_call_operand.vmem [shape: f32[1,32], index: 2, kind: input, shape index: {}]   ;;  %s297_s4 = inlined_call_operand.vmem [shape: f32[1,32], index: 4, kind: input, shape index: {}]   ;;  %s298_s5 = inlined_call_operand.vmem [shape: f32[1,32], index: 5, kind: input, shape index: {}]   ;;  %s299_s6 = inlined_call_operand.vmem [shape: bf16[16,32], index: 6, kind: output, shape index: {}]  }
   0x1   :  { %203 = vmatprep.subr.bf16.mxu0 %v220_v0  ;;  %v213_v1 = vld [vmem:[%s293_s1 + $0x8] sm:$0xff]   ;;  %207 = vmatprep.mubr.msk.bf16.mxu0 %vm221_vm1, %v220_v0  ;;  %29 = vst.msk [vmem:[#allocation2] sm:$0xff] %vm28_vm0, %v220_v0  ;;  %30 = vst.msk [vmem:[#allocation2 + $0x8] sm:$0xff] %vm28_vm0, %v220_v0  ;;  %v214_v2 = vld [vmem:[%s293_s1] sm:$0xff]  }
   0x2   :  { %204 = vmatpush3.bf16.msra.mxu0 %v213_v1  ;;  %v215_v3 = vld [vmem:[%s294_s0] sm:$0xff]  }
   0x3   :  { %205 = vmatprep.subr.bf16.mxu0 %v220_v0  ;;  %v197_v12 = vld [vmem:[%s295_s3] sm:$0xff]  }
   0x4   :  { %v189_v13 = vld [vmem:[%s296_s2] ss:$0 sm:$0xff]  ;;  %v198_v14 = vunpack.c.l.bf16 %v197_v12  ;;  %v199_v18 = vunpack.c.h.bf16 %v197_v12 }
   0x5   :  { %v190_v41 = vld [vmem:[%s297_s4] ss:$0 sm:$0xff] }
   0x6   :  { %206 = vmatpush3.bf16.msra.mxu0 %v214_v2  ;;  %v191_v43 = vld [vmem:[%s298_s5] ss:$0 sm:$0xff] }
   0x8   :  { %v31_v4 = vld [vmem:[#allocation2] sm:$0xff]  ;;  %v32_v8 = vld [vmem:[#allocation2 + $0x8] sm:$0xff] }
   0x9   :  { %208 = vmatmul.mubr.msk.bf16.vlgmr.msra.gmra.mxu0 %vm28_vm0, %v215_v3 }
  0xc9   :  { %v94_v5 = vpop.f32.mrf.mxu0 }
  0xca   :  { %v101_v6 = vadd.f32 %v94_v5, %v31_v4 }
  0xcb   :  { %v209_v7 = vpop.f32.mrf.mxu0 }
  0xcc   :  { %103 = vst.msk [vmem:[#allocation2] sm:$0xff] %vm28_vm0, %v101_v6 }
  0xcd   :  { %v97_v9 = vpop.f32.mrf.mxu0 }
  0xce   :  { %v102_v10 = vadd.f32 %v97_v9, %v32_v8 }
  0xcf   :  { %v210_v11 = vpop.f32.mrf.mxu0 }
  0xd0   :  { %104 = vst.msk [vmem:[#allocation2 + $0x8] sm:$0xff] %vm28_vm0, %v102_v10 }
  0xd3   :  { %v108_v15 = vld [vmem:[#allocation2] sm:$0xff] }
  0xd4   :  { %v117_v16 = vadd.f32 %v189_v13, %v108_v15 }
  0xd6   :  { %v123_v17 = vadd.f32 %v198_v14, %v117_v16 }
  0xd7   :  { %v109_v19 = vld [vmem:[#allocation2 + $0x8] sm:$0xff] }
  0xd8   :  { %v125_v20 = vsel %vm28_vm0, %v123_v17, 0.0  ;;  %v118_v21 = vadd.f32 %v189_v13, %v109_v19 }
  0xd9   :  { %126 = vadd.xlane.f32.xlu0 %v125_v20 }
  0xda   :  { %v124_v22 = vadd.f32 %v199_v18, %v118_v21 }
  0xdc   :  { %v128_v23 = vsel %vm28_vm0, %v124_v22, 0.0 }
  0xdd   :  { %129 = vadd.xlane.f32.xlu0 %v128_v23 }
 0x162   :  { %v127_v24 = vpop.xlane.xlu0 %126 }
 0x163   :  { %v132_v25 = vmul.f32 0.03125, %v127_v24 }
 0x165   :  { %v134_v26 = vsub.f32 %v123_v17, %v132_v25 }
 0x166   :  { %v130_v27 = vpop.xlane.xlu0 %129 }
 0x167   :  { %v133_v28 = vmul.f32 0.03125, %v130_v27  ;;  %v136_v29 = vmul.f32 %v134_v26, %v134_v26 }
 0x169   :  { %v135_v30 = vsub.f32 %v124_v22, %v133_v28  ;;  %v138_v31 = vsel %vm28_vm0, %v136_v29, 0.0 }
 0x16a   :  { %139 = vadd.xlane.f32.xlu1 %v138_v31 }
 0x16b   :  { %v137_v32 = vmul.f32 %v135_v30, %v135_v30 }
 0x16d   :  { %v141_v33 = vsel %vm28_vm0, %v137_v32, 0.0 }
 0x16e   :  { %142 = vadd.xlane.f32.xlu1 %v141_v33 }
 0x1f3   :  { %v140_v34 = vpop.xlane.xlu1 %139 }
 0x1f4   :  { %v144_v35 = vmul.f32 0.03125, %v140_v34 }
 0x1f6   :  { %v146_v36 = vadd.f32 1e-05, %v144_v35 }
 0x1f7   :  { %v143_v37 = vpop.xlane.xlu1 %142 }
 0x1f8   :  { %216 = vrsqrt.f32 %v146_v36  ;;  %v145_v38 = vmul.f32 0.03125, %v143_v37 }
 0x1fa   :  { %v147_v39 = vadd.f32 1e-05, %v145_v38 }
 0x1fc   :  { %218 = vrsqrt.f32 %v147_v39 }
 0x205   :  { %v217_v40 = vpop.eup %216 }
 0x206   :  { %v150_v42 = vmul.f32 %v217_v40, %v134_v26 }
 0x208   :  { %v159_v44 = vmul.f32 %v190_v41, %v150_v42 }
 0x209   :  { %v219_v45 = vpop.eup %218 }
 0x20a   :  { %v168_v46 = vadd.f32 %v191_v43, %v159_v44  ;;  %v151_v47 = vmul.f32 %v219_v45, %v135_v30 }
 0x20c   :  { %v194_v48 = vpack.c.bf16 %v168_v46, %v168_v46  ;;  %v160_v49 = vmul.f32 %v190_v41, %v151_v47 }
 0x20e   :  { %179 = vst.msk [vmem:[%s299_s6] sm:$0xf] %vm178_vm2, %v194_v48  ;;  %v169_v50 = vadd.f32 %v191_v43, %v160_v49 }
 0x210   :  { %v195_v51 = vpack.c.bf16 %v169_v50, %v169_v50 }
 0x212   :  { %180 = vst.msk [vmem:[%s299_s6 + $0x4] sm:$0xf] %vm178_vm2, %v195_v51 }

// kernel: transformer_forward.33
= control target key start
LH: loop header
LB: loop body
LE: loop exit
PB: predicated region body
PF: predicated region fallthrough
CT: control target
= control target key end

     0   :  { %vm19_vm0 = vcmask 785408   ;;  %v151_v0 = vmov 0.0   ;;  %vm152_vm1 = vmmov 0   ;;  %vm47_vm2 = vcmask 261120   ;;  %s195_s1 = inlined_call_operand.vmem [shape: bf16[32,96], index: 1, kind: input, shape index: {}]   ;;  %s196_s0 = inlined_call_operand.vmem [shape: bf16[16,32], index: 0, kind: input, shape index: {}]   ;;  %s197_s2 = inlined_call_operand.vmem [shape: f32[1,96], index: 2, kind: input, shape index: {}]   ;;  %s198_s3 = inlined_call_operand.vmem [shape: bf16[16,96], index: 3, kind: output, shape index: {}]  }
   0x1   :  { %138 = vmatprep.subr.bf16.mxu0 %v151_v0  ;;  %v148_v1 = vld [vmem:[%s195_s1 + $0x8] sm:$0xff]   ;;  %142 = vmatprep.mubr.msk.bf16.mxu0 %vm152_vm1, %v151_v0  ;;  %20 = vst.msk [vmem:[#allocation2] sm:$0xff] %vm19_vm0, %v151_v0  ;;  %21 = vst.msk [vmem:[#allocation2 + $0x8] sm:$0xff] %vm19_vm0, %v151_v0  ;;  %v149_v2 = vld [vmem:[%s195_s1] sm:$0xff]   ;;  %vm119_vm3 = vcmask 781312  }
   0x2   :  { %139 = vmatpush3.bf16.msra.mxu0 %v148_v1  ;;  %v150_v3 = vld [vmem:[%s196_s0] sm:$0xff]  }
   0x3   :  { %140 = vmatprep.subr.bf16.mxu0 %v151_v0  ;;  %v130_v12 = vld [vmem:[%s197_s2] ss:$0 sm:$0xff] }
   0x6   :  { %141 = vmatpush3.bf16.msra.mxu0 %v149_v2 }
   0x8   :  { %v22_v4 = vld [vmem:[#allocation2] sm:$0xff]  ;;  %v23_v8 = vld [vmem:[#allocation2 + $0x8] sm:$0xff] }
   0x9   :  { %143 = vmatmul.mubr.msk.bf16.vlgmr.msra.gmra.mxu0 %vm47_vm2, %v150_v3 }
  0xc9   :  { %v85_v5 = vpop.f32.mrf.mxu0 }
  0xca   :  { %v92_v6 = vadd.f32 %v85_v5, %v22_v4 }
  0xcb   :  { %v144_v7 = vpop.f32.mrf.mxu0 }
  0xcc   :  { %95 = vst.msk [vmem:[#allocation2] sm:$0xff] %vm19_vm0, %v92_v6 }
  0xcd   :  { %v88_v9 = vpop.f32.mrf.mxu0 }
  0xce   :  { %v93_v10 = vadd.f32 %v88_v9, %v23_v8 }
  0xcf   :  { %v145_v11 = vpop.f32.mrf.mxu0 }
  0xd0   :  { %96 = vst.msk [vmem:[#allocation2 + $0x8] sm:$0xff] %vm19_vm0, %v93_v10 }
  0xd3   :  { %v100_v13 = vld [vmem:[#allocation2] sm:$0xff] }
  0xd4   :  { %v109_v14 = vadd.f32 %v130_v12, %v100_v13 }
  0xd6   :  { %v133_v15 = vpack.c.bf16 %v109_v14, %v109_v14 }
  0xd7   :  { %v101_v16 = vld [vmem:[#allocation2 + $0x8] sm:$0xff] }
  0xd8   :  { %120 = vst.msk [vmem:[%s198_s3] sm:$0xf] %vm119_vm3, %v133_v15  ;;  %v110_v17 = vadd.f32 %v130_v12, %v101_v16 }
  0xda   :  { %v134_v18 = vpack.c.bf16 %v110_v17, %v110_v17 }
  0xdc   :  { %121 = vst.msk [vmem:[%s198_s3 + $0x4] sm:$0xf] %vm119_vm3, %v134_v18 }

// kernel: transformer_forward.34
= control target key start
LH: loop header
LB: loop body
LE: loop exit
PB: predicated region body
PF: predicated region fallthrough
CT: control target
= control target key end

     0   :  { %s875_s15 = smov 0   ;;  %s877_s16 = smov 0   ;;  %s952_s0 = inlined_call_operand.vmem [shape: bf16[3,2,4,8,8], index: 0, kind: input, shape index: {}, may-alias: {0,1,2}]   ;;  %s953_s1 = inlined_call_operand.vmem [shape: bf16[3,2,4,8,8], index: 1, kind: input, shape index: {}, may-alias: {0,1,2}]   ;;  %s954_s2 = inlined_call_operand.vmem [shape: bf16[3,2,4,8,8], index: 2, kind: input, shape index: {}, may-alias: {0,1,2}]   ;;  %s955_s3 = inlined_call_operand.vmem [shape: f32[2,1,8], index: 3, kind: input, shape index: {}]   ;;  %s956_s4 = inlined_call_operand.vmem [shape: bf16[2,4,8,8], index: 4, kind: output, shape index: {}]  }
   0x1   :  { %s879_s17 = smov 0   ;;  %s881_s18 = smov 0  }
   0x2   :  { %s883_s19 = smov 0  }
   0x3 LB: > { %s36_s20 = sadd.s32 1, %s836_s17  ;;  %s40_s21 = sadd.s32 1, %s840_s18  ;;  %s844_s19 = sphi %s883_s19, %s14_s19   ;;  %s840_s18 = sphi %s881_s18, %s960_s18   ;;  %s836_s17 = sphi %s879_s17, %s959_s17   ;;  %s832_s16 = sphi %s877_s16, %s958_s16   ;;  %s828_s15 = sphi %s875_s15, %s957_s15  }
   0x4   : > { %p38_p0 = scmp.ge.s32.totalorder %s36_s20, 4  ;;  %p722_p1 = scmp.ge.s32.totalorder %s844_s19, 1 }
   0x5   : > { %p257_p2 = scmp.lt.s32.totalorder %s844_s19, 9 }
   0x6   : > { %s962_s20 = smov (%p38_p0, %s36_s20), 0  ;;  %s964_s21 = smov (!%p38_p0, %s40_s21), %s840_s18 }
   0x7   : > { %p258_p3 = pnand %p722_p1, %p257_p2  ;;  %p42_p4 = scmp.ge.s32.totalorder %s964_s21, 2 }
   0x8   : > { %p325_p5 = scmp.lt.s32.totalorder (!%p258_p3), %s832_s16, 1  ;;  %p327_p6 = scmp.lt.s32.totalorder (!%p258_p3), %s828_s15, 3 }
   0x9   : > { %s966_s21 = smov (%p42_p4, %s964_s21), 0  ;;  %261 = sbr.rel (%p258_p3) target bundleno = 799 (0x31f), region = 36 }
   0xe   : > { %vm385_vm0 = vcmask 64512   ;;  %v846_v0 = vmov 0.0   ;;  %vm847_vm1 = vmmov 0   ;;  %s968_s16 = smov (!%p325_p5, %s832_s16), 1  ;;  %s970_s15 = smov (!%p327_p6, %s828_s15), 3  ;;  %vm382_vm2 = vcmask 7168  }
   0xf   : > { %742 = vmatprep.subr.bf16.mxu0 %v846_v0  ;;  %386 = vst.msk [vmem:[#allocation4] sm:$0xff] %vm385_vm0, %v846_v0  ;;  %744 = vmatprep.mubr.msk.bf16.mxu0 %vm847_vm1, %v846_v0  ;;  %s723_s22 = sshll.u32 %s968_s16, 2  ;;  %v848_v4 = vmov -1e+30   ;;  %v444_v5 = vlaneseq  ;;  %s365_s7 = scalar_lea.vmem %s955_s3, %s968_s16  ;;  %v849_v16 = vmov 0   ;;  %vm491_vm4 = vcmask 1043456  }
  0x10   : > { %748 = vmatprep.subr.bf16.mxu1 %v846_v0  ;;  %750 = vmatprep.mubr.msk.bf16.mxu1 %vm847_vm1, %v846_v0  ;;  %s333_s23 = sadd.s32 %s723_s22, %s970_s15  ;;  %383 = vst.msk [vmem:[#allocation2] sm:$0xff] %vm382_vm2, %v848_v4  ;;  %384 = vst.msk [vmem:[#allocation3] sm:$0xff] %vm382_vm2, %v846_v0  ;;  %v732_v8 = vld [vmem:[%s365_s7] ss:$0 sm:$0xff]  ;;  %vm551_vm5 = vcmask 60416  }
  0x11   : > { %s906_s24 = sshll.u32 %s333_s23, 2  ;;  %v445_v6 = vshrl.u32 %v444_v5, 7  ;;  %v450_v7 = vand.u32 127, %v444_v5  ;;  %798 = vset.pattern.permute.xlu0 %v849_v16  ;;  %799 = vset.pattern.permute.xlu1 %v849_v16 }
  0x12   : > { %s638_s27 = scalar_lea.vmem %s953_s1, %s906_s24  ;;  %s335_s30 = scalar_lea.vmem %s952_s0, %s906_s24 }
  0x13   : > { %v731_v1 = vld [vmem:[%s638_s27 + $0x20] sm:$0xf]  ;;  %vm453_vm3 = vcmp.le.s32.totalorder %v450_v7, %v445_v6  ;;  %s644_s10 = scalar_lea.vmem %s954_s2, %s906_s24  ;;  %s376_s13 = scalar_lea.vmem %s956_s4, %s906_s24 }
  0x14   : > { %v401_v2 = vsel %vm385_vm0, %v731_v1, 0  ;;  %v387_v3 = vld [vmem:[%s335_s30] sm:$0xf] }
  0x15   : > { %743 = vmatpush3.bf16.xpose.msra.mxu0 %v401_v2  ;;  %v734_v21 = vld [vmem:[%s644_s10 + $0x40] sm:$0xf] }
  0x16   : > { %v493_v22 = vsel %vm491_vm4, %v734_v21, 0  ;;  %v479_v37 = vld [vmem:[#allocation4] sm:$0xff] }
  0x17   : > { %v455_v17 = vld [vmem:[#allocation2] sm:$0xff]  ;;  %749 = vmatpush3.bf16.msra.mxu1 %v493_v22  ;;  %v471_v31 = vld [vmem:[#allocation3] sm:$0xff] }
  0x1c   : > { %745 = vmatmul.mubr.msk.bf16.vlgmr.msra.gmra.mxu0 %vm385_vm0, %v387_v3 }
  0xdc   : > { %v437_v9 = vpop.f32.mrf.mxu0 }
  0xdd   : > { %v438_v10 = vadd.f32 %v732_v8, %v437_v9 }
  0xde   : > { %v746_v11 = vpop.f32.mrf.mxu0 }
  0xdf   : > { %v454_v12 = vsel %vm453_vm3, %v438_v10, -1e+09 }
  0xe0   : > { %v440_v13 = vpop.f32.mrf.mxu0  ;;  %v456_v14 = vsel %vm385_vm0, %v454_v12, -inf }
  0xe1   : > { %457 = vmax.xlane.f32.xlu0 %v456_v14 }
  0xe2   : > { %v747_v15 = vpop.f32.mrf.mxu0 }
 0x16a   : > { %v458_v18 = vpop.xlane.xlu0 %457 }
 0x16b   : > { %v459_v19 = vmax.f32 %v455_v17, %v458_v18 }
 0x16d   : > { %v460_v20 = vsub.f32 %v455_v17, %v459_v19  ;;  %537 = vst.msk [vmem:[#allocation2] sm:$0xff] %vm382_vm2, %v459_v19  ;;  %465 = vperm.xlu0 %798, %v459_v19  }
 0x16f   : > { %v461_v27 = vmul.f32 1.442695, %v460_v20 }
 0x1e8   : > { %v466_v23 = vpop.permute.xlu0 %465 }
 0x1e9   : > { %v468_v24 = vsub.f32 %v454_v12, %v466_v23 }
 0x1eb   : > { %v469_v25 = vmul.f32 1.442695, %v468_v24 }
 0x1ed   : > { %800 = vpow2.f32 %v469_v25 }
 0x1ee   : > { %802 = vpow2.f32 %v461_v27 }
 0x1fa   : > { %v801_v26 = vpop.eup %800 }
 0x1fb   : > { %v473_v28 = vsel %vm385_vm0, %v801_v26, 0.0  ;;  %v486_v29 = vpack.c.bf16 %v801_v26, %v801_v26  ;;  %v803_v30 = vpop.eup %802 }
 0x1fc   : > { %474 = vadd.xlane.f32.xlu1 %v473_v28  ;;  %v472_v32 = vmul.f32 %v803_v30, %v471_v31 }
 0x1fd   : > { %751 = vmatmul.mubr.msk.bf16.vlgmr.msra.gmra.mxu1 %vm385_vm0, %v486_v29 }
 0x20d   : > { %482 = vperm.xlu1 %799, %v803_v30  }
 0x285   : > { %v475_v33 = vpop.xlane.xlu1 %474 }
 0x286   : > { %v476_v34 = vadd.f32 %v475_v33, %v472_v32 }
 0x288   : > { %478 = vst.msk [vmem:[#allocation3] sm:$0xff] %vm382_vm2, %v476_v34 }
 0x289   : > { %v483_v38 = vpop.permute.xlu1 %482 }
 0x28a   : > { %v485_v39 = vmul.f32 %v483_v38, %v479_v37 }
 0x28f   : > { %v542_v35 = vld [vmem:[#allocation3] sm:$0xff] }
 0x290   : > { %804 = vrcp.f32 %v542_v35 }
 0x29d   : > { %v805_v36 = vpop.eup %804 }
 0x29e   : > { %546 = vperm.xlu1 %799, %v805_v36  }
 0x2bd   : > { %v529_v40 = vpop.f32.mrf.mxu1 }
 0x2be   : > { %v535_v41 = vadd.f32 %v529_v40, %v485_v39 }
 0x2bf   : > { %v752_v42 = vpop.f32.mrf.mxu1 }
 0x2c0   : > { %536 = vst.msk [vmem:[#allocation4] sm:$0xff] %vm385_vm0, %v535_v41 }
 0x2c1   : > { %v532_v43 = vpop.f32.mrf.mxu1 }
 0x2c3   : > { %v753_v44 = vpop.f32.mrf.mxu1 }
 0x2c7   : > { %v541_v45 = vld [vmem:[#allocation4] sm:$0xff] }
 0x319   : > { %v547_v46 = vpop.permute.xlu1 %546 }
 0x31a   : > { %v549_v47 = vmul.f32 %v547_v46, %v541_v45 }
 0x31c   : > { %v550_v48 = vpack.c.bf16 %v549_v47, %v549_v47 }
 0x31e   : > { %552 = vst.msk [vmem:[%s376_s13] sm:$0xf] %vm551_vm5, %v550_v48 }
 0x31f PF: > { %s14_s19 = sadd.s32 1, %s844_s19   ;;  %s957_s15 = smov %s836_s17 }
 0x320   : > { %p11_p7 = scmp.ge.s32.totalorder %s14_s19, 10   ;;  %s958_s16 = smov %s840_s18 }
 0x321   : > { %s959_s17 = smov %s962_s20  ;;  %s960_s18 = smov %s966_s21 }
 0x322   :  { %13 = sbr.rel (!%p11_p7) target bundleno = 3 (0x3), region = 83 }

// kernel: transformer_forward.36
= control target key start
LH: loop header
LB: loop body
LE: loop exit
PB: predicated region body
PF: predicated region fallthrough
CT: control target
= control target key end

     0   :  { %vm19_vm0 = vcmask 261120   ;;  %v150_v0 = vmov 0.0   ;;  %vm151_vm1 = vmmov 0   ;;  %vm118_vm2 = vcmask 257024   ;;  %s195_s1 = inlined_call_operand.vmem [shape: bf16[32,32], index: 1, kind: input, shape index: {}]   ;;  %s196_s0 = inlined_call_operand.vmem [shape: bf16[16,32], index: 0, kind: input, shape index: {}]   ;;  %s197_s2 = inlined_call_operand.vmem [shape: f32[1,32], index: 2, kind: input, shape index: {}]   ;;  %s198_s3 = inlined_call_operand.vmem [shape: bf16[16,32], index: 3, kind: output, shape index: {}]  }
   0x1   :  { %137 = vmatprep.subr.bf16.mxu0 %v150_v0  ;;  %v147_v1 = vld [vmem:[%s195_s1 + $0x8] sm:$0xff]   ;;  %141 = vmatprep.mubr.msk.bf16.mxu0 %vm151_vm1, %v150_v0  ;;  %20 = vst.msk [vmem:[#allocation2] sm:$0xff] %vm19_vm0, %v150_v0  ;;  %21 = vst.msk [vmem:[#allocation2 + $0x8] sm:$0xff] %vm19_vm0, %v150_v0  ;;  %v148_v2 = vld [vmem:[%s195_s1] sm:$0xff]  }
   0x2   :  { %138 = vmatpush3.bf16.msra.mxu0 %v147_v1  ;;  %v149_v3 = vld [vmem:[%s196_s0] sm:$0xff]  }
   0x3   :  { %139 = vmatprep.subr.bf16.mxu0 %v150_v0  ;;  %v129_v12 = vld [vmem:[%s197_s2] ss:$0 sm:$0xff] }
   0x6   :  { %140 = vmatpush3.bf16.msra.mxu0 %v148_v2 }
   0x8   :  { %v22_v4 = vld [vmem:[#allocation2] sm:$0xff]  ;;  %v23_v8 = vld [vmem:[#allocation2 + $0x8] sm:$0xff] }
   0x9   :  { %142 = vmatmul.mubr.msk.bf16.vlgmr.msra.gmra.mxu0 %vm19_vm0, %v149_v3 }
  0xc9   :  { %v85_v5 = vpop.f32.mrf.mxu0 }
  0xca   :  { %v92_v6 = vadd.f32 %v85_v5, %v22_v4 }
  0xcb   :  { %v143_v7 = vpop.f32.mrf.mxu0 }
  0xcc   :  { %94 = vst.msk [vmem:[#allocation2] sm:$0xff] %vm19_vm0, %v92_v6 }
  0xcd   :  { %v88_v9 = vpop.f32.mrf.mxu0 }
  0xce   :  { %v93_v10 = vadd.f32 %v88_v9, %v23_v8 }
  0xcf   :  { %v144_v11 = vpop.f32.mrf.mxu0 }
  0xd0   :  { %95 = vst.msk [vmem:[#allocation2 + $0x8] sm:$0xff] %vm19_vm0, %v93_v10 }
  0xd3   :  { %v99_v13 = vld [vmem:[#allocation2] sm:$0xff] }
  0xd4   :  { %v108_v14 = vadd.f32 %v129_v12, %v99_v13 }
  0xd6   :  { %v132_v15 = vpack.c.bf16 %v108_v14, %v108_v14 }
  0xd7   :  { %v100_v16 = vld [vmem:[#allocation2 + $0x8] sm:$0xff] }
  0xd8   :  { %119 = vst.msk [vmem:[%s198_s3] sm:$0xf] %vm118_vm2, %v132_v15  ;;  %v109_v17 = vadd.f32 %v129_v12, %v100_v16 }
  0xda   :  { %v133_v18 = vpack.c.bf16 %v109_v17, %v109_v17 }
  0xdc   :  { %120 = vst.msk [vmem:[%s198_s3 + $0x4] sm:$0xf] %vm118_vm2, %v133_v18 }

// kernel: transformer_forward.37
= control target key start
LH: loop header
LB: loop body
LE: loop exit
PB: predicated region body
PF: predicated region fallthrough
CT: control target
= control target key end

     0   :  { %vm19_vm0 = vcmask 523264   ;;  %v151_v0 = vmov 0.0   ;;  %vm152_vm1 = vmmov 0   ;;  %vm47_vm2 = vcmask 261120   ;;  %s195_s1 = inlined_call_operand.vmem [shape: bf16[32,64], index: 1, kind: input, shape index: {}]   ;;  %s196_s0 = inlined_call_operand.vmem [shape: bf16[16,32], index: 0, kind: input, shape index: {}]   ;;  %s197_s2 = inlined_call_operand.vmem [shape: f32[1,64], index: 2, kind: input, shape index: {}]   ;;  %s198_s3 = inlined_call_operand.vmem [shape: bf16[16,64], index: 3, kind: output, shape index: {}]  }
   0x1   :  { %138 = vmatprep.subr.bf16.mxu0 %v151_v0  ;;  %v148_v1 = vld [vmem:[%s195_s1 + $0x8] sm:$0xff]   ;;  %142 = vmatprep.mubr.msk.bf16.mxu0 %vm152_vm1, %v151_v0  ;;  %20 = vst.msk [vmem:[#allocation2] sm:$0xff] %vm19_vm0, %v151_v0  ;;  %21 = vst.msk [vmem:[#allocation2 + $0x8] sm:$0xff] %vm19_vm0, %v151_v0  ;;  %v149_v2 = vld [vmem:[%s195_s1] sm:$0xff]   ;;  %vm119_vm3 = vcmask 519168  }
   0x2   :  { %139 = vmatpush3.bf16.msra.mxu0 %v148_v1  ;;  %v150_v3 = vld [vmem:[%s196_s0] sm:$0xff]  }
   0x3   :  { %140 = vmatprep.subr.bf16.mxu0 %v151_v0  ;;  %v130_v12 = vld [vmem:[%s197_s2] ss:$0 sm:$0xff] }
   0x6   :  { %141 = vmatpush3.bf16.msra.mxu0 %v149_v2 }
   0x8   :  { %v22_v4 = vld [vmem:[#allocation2] sm:$0xff]  ;;  %v23_v8 = vld [vmem:[#allocation2 + $0x8] sm:$0xff] }
   0x9   :  { %143 = vmatmul.mubr.msk.bf16.vlgmr.msra.gmra.mxu0 %vm47_vm2, %v150_v3 }
  0xc9   :  { %v85_v5 = vpop.f32.mrf.mxu0 }
  0xca   :  { %v92_v6 = vadd.f32 %v85_v5, %v22_v4 }
  0xcb   :  { %v144_v7 = vpop.f32.mrf.mxu0 }
  0xcc   :  { %95 = vst.msk [vmem:[#allocation2] sm:$0xff] %vm19_vm0, %v92_v6 }
  0xcd   :  { %v88_v9 = vpop.f32.mrf.mxu0 }
  0xce   :  { %v93_v10 = vadd.f32 %v88_v9, %v23_v8 }
  0xcf   :  { %v145_v11 = vpop.f32.mrf.mxu0 }
  0xd0   :  { %96 = vst.msk [vmem:[#allocation2 + $0x8] sm:$0xff] %vm19_vm0, %v93_v10 }
  0xd3   :  { %v100_v13 = vld [vmem:[#allocation2] sm:$0xff] }
  0xd4   :  { %v109_v14 = vadd.f32 %v130_v12, %v100_v13 }
  0xd6   :  { %v133_v15 = vpack.c.bf16 %v109_v14, %v109_v14 }
  0xd7   :  { %v101_v16 = vld [vmem:[#allocation2 + $0x8] sm:$0xff] }
  0xd8   :  { %120 = vst.msk [vmem:[%s198_s3] sm:$0xf] %vm119_vm3, %v133_v15  ;;  %v110_v17 = vadd.f32 %v130_v12, %v101_v16 }
  0xda   :  { %v134_v18 = vpack.c.bf16 %v110_v17, %v110_v17 }
  0xdc   :  { %121 = vst.msk [vmem:[%s198_s3 + $0x4] sm:$0xf] %vm119_vm3, %v134_v18 }

// kernel: transformer_forward.28
= control target key start
LH: loop header
LB: loop body
LE: loop exit
PB: predicated region body
PF: predicated region fallthrough
CT: control target
= control target key end

     0   :  { %vm31_vm0 = vcmask 261120   ;;  %v384_v0 = vmov 0.0   ;;  %vm385_vm1 = vmmov 0   ;;  %vm296_vm2 = vcmask 257024   ;;  %s489_s1 = inlined_call_operand.vmem [shape: bf16[32,128], index: 1, kind: input, shape index: {}]   ;;  %s490_s3 = inlined_call_operand.vmem [shape: bf16[128,32], index: 3, kind: input, shape index: {}]   ;;  %s491_s0 = inlined_call_operand.vmem [shape: bf16[16,32], index: 0, kind: input, shape index: {}]   ;;  %s492_s2 = inlined_call_operand.vmem [shape: f32[1,128], index: 2, kind: input, shape index: {}]   ;;  %s493_s4 = inlined_call_operand.vmem [shape: f32[1,32], index: 4, kind: input, shape index: {}]   ;;  %s494_s5 = inlined_call_operand.vmem [shape: f32[1,32], index: 5, kind: input, shape index: {}]   ;;  %s495_s6 = inlined_call_operand.vmem [shape: f32[1,32], index: 6, kind: input, shape index: {}]   ;;  %s496_s7 = inlined_call_operand.vmem [shape: bf16[16,32], index: 7, kind: output, shape index: {}]  }
   0x1   :  { %339 = vmatprep.subr.bf16.mxu0 %v384_v0  ;;  %v369_v1 = vld [vmem:[%s489_s1 + $0x8] sm:$0xff]   ;;  %343 = vmatprep.mubr.msk.bf16.mxu0 %vm385_vm1, %v384_v0  ;;  %32 = vst.msk [vmem:[#allocation2] sm:$0xff] %vm31_vm0, %v384_v0  ;;  %33 = vst.msk [vmem:[#allocation2 + $0x8] sm:$0xff] %vm31_vm0, %v384_v0  ;;  %v370_v2 = vld [vmem:[%s489_s1] sm:$0xff]  }
   0x2   :  { %347 = vmatprep.subr.bf16.mxu1 %v384_v0  ;;  %363 = vmatprep.mubr.msk.bf16.mxu1 %vm385_vm1, %v384_v0  ;;  %v372_v3 = vld [vmem:[%s490_s3 + $0x38] sm:$0xff]   ;;  %v371_v4 = vld [vmem:[%s491_s0] sm:$0xff]   ;;  %v373_v5 = vld [vmem:[%s490_s3 + $0x30] sm:$0xff]  }
   0x3   :  { %340 = vmatpush3.bf16.msra.mxu0 %v369_v1  ;;  %348 = vmatpush3.bf16.msra.mxu1 %v372_v3  ;;  %v374_v6 = vld [vmem:[%s490_s3 + $0x28] sm:$0xff]   ;;  %v375_v7 = vld [vmem:[%s490_s3 + $0x20] sm:$0xff]   ;;  %v376_v8 = vld [vmem:[%s490_s3 + $0x18] sm:$0xff]  }
   0x4   :  { %341 = vmatprep.subr.bf16.mxu0 %v384_v0  ;;  %349 = vmatprep.subr.bf16.mxu1 %v384_v0  ;;  %v377_v9 = vld [vmem:[%s490_s3 + $0x10] sm:$0xff]   ;;  %v378_v10 = vld [vmem:[%s490_s3 + $0x8] sm:$0xff]   ;;  %v379_v11 = vld [vmem:[%s490_s3] sm:$0xff]  }
   0x5   :  { %v303_v12 = vld [vmem:[%s492_s2] ss:$0 sm:$0xff] }
   0x6   :  { %v324_v30 = vld [vmem:[%s491_s0] sm:$0xff]  }
   0x7   :  { %342 = vmatpush3.bf16.msra.mxu0 %v370_v2  ;;  %350 = vmatpush3.bf16.msra.mxu1 %v373_v5  ;;  %v316_v31 = vld [vmem:[%s493_s4] ss:$0 sm:$0xff]  ;;  %v325_v32 = vunpack.c.l.bf16 %v324_v30  ;;  %v326_v36 = vunpack.c.h.bf16 %v324_v30 }
   0x8   :  { %351 = vmatprep.subr.bf16.mxu1 %v384_v0  ;;  %v112_v22 = vld [vmem:[#allocation2] sm:$0xff]  ;;  %v113_v26 = vld [vmem:[#allocation2 + $0x8] sm:$0xff] }
   0x9   :  { %v317_v59 = vld [vmem:[%s494_s5] ss:$0 sm:$0xff] }
   0xa   :  { %344 = vmatmul.mubr.msk.bf16.vlgmr.msra.gmra.mxu0 %vm31_vm0, %v371_v4  ;;  %v318_v61 = vld [vmem:[%s495_s6] ss:$0 sm:$0xff] }
   0xb   :  { %352 = vmatpush3.bf16.msra.mxu1 %v374_v6 }
   0xc   :  { %353 = vmatprep.subr.bf16.mxu1 %v384_v0 }
   0xf   :  { %354 = vmatpush3.bf16.msra.mxu1 %v375_v7 }
  0x10   :  { %355 = vmatprep.subr.bf16.mxu1 %v384_v0 }
  0x13   :  { %356 = vmatpush3.bf16.msra.mxu1 %v376_v8 }
  0x14   :  { %357 = vmatprep.subr.bf16.mxu1 %v384_v0 }
  0x17   :  { %358 = vmatpush3.bf16.msra.mxu1 %v377_v9 }
  0x18   :  { %359 = vmatprep.subr.bf16.mxu1 %v384_v0 }
  0x1b   :  { %360 = vmatpush3.bf16.msra.mxu1 %v378_v10 }
  0x1c   :  { %361 = vmatprep.subr.bf16.mxu1 %v384_v0 }
  0x1f   :  { %362 = vmatpush3.bf16.msra.mxu1 %v379_v11 }
  0xca   :  { %v102_v13 = vpop.f32.mrf.mxu0 }
  0xcb   :  { %v103_v15 = vadd.f32 %v303_v12, %v102_v13 }
  0xcc   :  { %v345_v14 = vpop.f32.mrf.mxu0 }
  0xcd   :  { %v109_v19 = vmax.f32 %v103_v15, 0.0 }
  0xce   :  { %v105_v16 = vpop.f32.mrf.mxu0 }
  0xcf   :  { %v106_v17 = vadd.f32 %v303_v12, %v105_v16 }
  0xd0   :  { %v346_v18 = vpop.f32.mrf.mxu0 }
  0xd1   :  { %v110_v20 = vmax.f32 %v106_v17, 0.0 }
  0xd3   :  { %v111_v21 = vpack.c.bf16 %v110_v20, %v109_v19 }
  0xd5   :  { %364 = vmatmul.mubr.bf16.vlgmr.msra.gmra.mxu1 %v111_v21 }
 0x195   :  { %v212_v23 = vpop.f32.mrf.mxu1 }
 0x196   :  { %v219_v24 = vadd.f32 %v212_v23, %v112_v22 }
 0x197   :  { %v365_v25 = vpop.f32.mrf.mxu1 }
 0x198   :  { %221 = vst.msk [vmem:[#allocation2] sm:$0xff] %vm31_vm0, %v219_v24 }
 0x199   :  { %v215_v27 = vpop.f32.mrf.mxu1 }
 0x19a   :  { %v220_v28 = vadd.f32 %v215_v27, %v113_v26 }
 0x19b   :  { %v366_v29 = vpop.f32.mrf.mxu1 }
 0x19c   :  { %222 = vst.msk [vmem:[#allocation2 + $0x8] sm:$0xff] %vm31_vm0, %v220_v28 }
 0x19f   :  { %v226_v33 = vld [vmem:[#allocation2] sm:$0xff] }
 0x1a0   :  { %v235_v34 = vadd.f32 %v316_v31, %v226_v33 }
 0x1a2   :  { %v241_v35 = vadd.f32 %v325_v32, %v235_v34 }
 0x1a3   :  { %v227_v37 = vld [vmem:[#allocation2 + $0x8] sm:$0xff] }
 0x1a4   :  { %v243_v38 = vsel %vm31_vm0, %v241_v35, 0.0  ;;  %v236_v39 = vadd.f32 %v316_v31, %v227_v37 }
 0x1a5   :  { %244 = vadd.xlane.f32.xlu0 %v243_v38 }
 0x1a6   :  { %v242_v40 = vadd.f32 %v326_v36, %v236_v39 }
 0x1a8   :  { %v246_v41 = vsel %vm31_vm0, %v242_v40, 0.0 }
 0x1a9   :  { %247 = vadd.xlane.f32.xlu0 %v246_v41 }
 0x22e   :  { %v245_v42 = vpop.xlane.xlu0 %244 }
 0x22f   :  { %v250_v43 = vmul.f32 0.03125, %v245_v42 }
 0x231   :  { %v252_v44 = vsub.f32 %v241_v35, %v250_v43 }
 0x232   :  { %v248_v45 = vpop.xlane.xlu0 %247 }
 0x233   :  { %v251_v46 = vmul.f32 0.03125, %v248_v45  ;;  %v254_v47 = vmul.f32 %v252_v44, %v252_v44 }
 0x235   :  { %v253_v48 = vsub.f32 %v242_v40, %v251_v46  ;;  %v256_v49 = vsel %vm31_vm0, %v254_v47, 0.0 }
 0x236   :  { %257 = vadd.xlane.f32.xlu1 %v256_v49 }
 0x237   :  { %v255_v50 = vmul.f32 %v253_v48, %v253_v48 }
 0x239   :  { %v259_v51 = vsel %vm31_vm0, %v255_v50, 0.0 }
 0x23a   :  { %260 = vadd.xlane.f32.xlu1 %v259_v51 }
 0x2bf   :  { %v258_v52 = vpop.xlane.xlu1 %257 }
 0x2c0   :  { %v262_v53 = vmul.f32 0.03125, %v258_v52 }
 0x2c2   :  { %v264_v54 = vadd.f32 1e-05, %v262_v53 }
 0x2c3   :  { %v261_v55 = vpop.xlane.xlu1 %260 }
 0x2c4   :  { %380 = vrsqrt.f32 %v264_v54  ;;  %v263_v56 = vmul.f32 0.03125, %v261_v55 }
 0x2c6   :  { %v265_v57 = vadd.f32 1e-05, %v263_v56 }
 0x2c8   :  { %382 = vrsqrt.f32 %v265_v57 }
 0x2d1   :  { %v381_v58 = vpop.eup %380 }
 0x2d2   :  { %v268_v60 = vmul.f32 %v381_v58, %v252_v44 }
 0x2d4   :  { %v277_v62 = vmul.f32 %v317_v59, %v268_v60 }
 0x2d5   :  { %v383_v63 = vpop.eup %382 }
 0x2d6   :  { %v286_v0 = vadd.f32 %v318_v61, %v277_v62  ;;  %v269_v1 = vmul.f32 %v383_v63, %v253_v48 }
 0x2d8   :  { %v321_v2 = vpack.c.bf16 %v286_v0, %v286_v0  ;;  %v278_v3 = vmul.f32 %v317_v59, %v269_v1 }
 0x2da   :  { %297 = vst.msk [vmem:[%s496_s7] sm:$0xf] %vm296_vm2, %v321_v2  ;;  %v287_v4 = vadd.f32 %v318_v61, %v278_v3 }
 0x2dc   :  { %v322_v5 = vpack.c.bf16 %v287_v4, %v287_v4 }
 0x2de   :  { %298 = vst.msk [vmem:[%s496_s7 + $0x4] sm:$0xf] %vm296_vm2, %v322_v5 }

// kernel: transformer_forward.26
= control target key start
LH: loop header
LB: loop body
LE: loop exit
PB: predicated region body
PF: predicated region fallthrough
CT: control target
= control target key end

     0   :  { %s863_s15 = smov 0   ;;  %s865_s16 = smov 0   ;;  %s940_s0 = inlined_call_operand.vmem [shape: bf16[3,2,4,8,8], index: 0, kind: input, shape index: {}, may-alias: {0,1,2}]   ;;  %s941_s1 = inlined_call_operand.vmem [shape: bf16[3,2,4,8,8], index: 1, kind: input, shape index: {}, may-alias: {0,1,2}]   ;;  %s942_s2 = inlined_call_operand.vmem [shape: bf16[3,2,4,8,8], index: 2, kind: input, shape index: {}, may-alias: {0,1,2}]   ;;  %s943_s3 = inlined_call_operand.vmem [shape: f32[2,1,8], index: 3, kind: input, shape index: {}]   ;;  %s944_s4 = inlined_call_operand.vmem [shape: bf16[2,4,8,8], index: 4, kind: output, shape index: {}]  }
   0x1   :  { %s867_s17 = smov 0   ;;  %s869_s18 = smov 0  }
   0x2   :  { %s871_s19 = smov 0  }
   0x3 LB: > { %s36_s20 = sadd.s32 1, %s824_s17  ;;  %s40_s21 = sadd.s32 1, %s828_s18  ;;  %s832_s19 = sphi %s871_s19, %s14_s19   ;;  %s828_s18 = sphi %s869_s18, %s948_s18   ;;  %s824_s17 = sphi %s867_s17, %s947_s17   ;;  %s820_s16 = sphi %s865_s16, %s946_s16   ;;  %s816_s15 = sphi %s863_s15, %s945_s15  }
   0x4   : > { %p38_p0 = scmp.ge.s32.totalorder %s36_s20, 4  ;;  %p710_p1 = scmp.ge.s32.totalorder %s832_s19, 1 }
   0x5   : > { %p257_p2 = scmp.lt.s32.totalorder %s832_s19, 9 }
   0x6   : > { %s950_s20 = smov (%p38_p0, %s36_s20), 0  ;;  %s952_s21 = smov (!%p38_p0, %s40_s21), %s828_s18 }
   0x7   : > { %p258_p3 = pnand %p710_p1, %p257_p2  ;;  %p42_p4 = scmp.ge.s32.totalorder %s952_s21, 2 }
   0x8   : > { %p325_p5 = scmp.lt.s32.totalorder (!%p258_p3), %s820_s16, 1  ;;  %p327_p6 = scmp.lt.s32.totalorder (!%p258_p3), %s816_s15, 3 }
   0x9   : > { %s954_s21 = smov (%p42_p4, %s952_s21), 0  ;;  %261 = sbr.rel (%p258_p3) target bundleno = 798 (0x31e), region = 36 }
   0xe   : > { %vm385_vm0 = vcmask 64512   ;;  %v834_v0 = vmov 0.0   ;;  %vm835_vm1 = vmmov 0   ;;  %s956_s16 = smov (!%p325_p5, %s820_s16), 1  ;;  %s958_s15 = smov (!%p327_p6, %s816_s15), 3  ;;  %vm382_vm2 = vcmask 7168  }
   0xf   : > { %730 = vmatprep.subr.bf16.mxu0 %v834_v0  ;;  %386 = vst.msk [vmem:[#allocation4] sm:$0xff] %vm385_vm0, %v834_v0  ;;  %732 = vmatprep.mubr.msk.bf16.mxu0 %vm835_vm1, %v834_v0  ;;  %s711_s22 = sshll.u32 %s956_s16, 2  ;;  %v836_v4 = vmov -1e+30   ;;  %s365_s7 = scalar_lea.vmem %s943_s3, %s956_s16  ;;  %v837_v12 = vmov 0   ;;  %vm479_vm3 = vcmask 1043456  }
  0x10   : > { %736 = vmatprep.subr.bf16.mxu1 %v834_v0  ;;  %738 = vmatprep.mubr.msk.bf16.mxu1 %vm835_vm1, %v834_v0  ;;  %s333_s23 = sadd.s32 %s711_s22, %s958_s15  ;;  %383 = vst.msk [vmem:[#allocation2] sm:$0xff] %vm382_vm2, %v836_v4  ;;  %384 = vst.msk [vmem:[#allocation3] sm:$0xff] %vm382_vm2, %v834_v0  ;;  %v720_v5 = vld [vmem:[%s365_s7] ss:$0 sm:$0xff]  ;;  %vm539_vm4 = vcmask 60416  }
  0x11   : > { %s894_s24 = sshll.u32 %s333_s23, 2  ;;  %786 = vset.pattern.permute.xlu0 %v837_v12  ;;  %787 = vset.pattern.permute.xlu1 %v837_v12 }
  0x12   : > { %s626_s27 = scalar_lea.vmem %s941_s1, %s894_s24  ;;  %s335_s30 = scalar_lea.vmem %s940_s0, %s894_s24 }
  0x13   : > { %v719_v1 = vld [vmem:[%s626_s27 + $0x20] sm:$0xf]  ;;  %s632_s10 = scalar_lea.vmem %s942_s2, %s894_s24  ;;  %s376_s13 = scalar_lea.vmem %s944_s4, %s894_s24 }
  0x14   : > { %v401_v2 = vsel %vm385_vm0, %v719_v1, 0  ;;  %v387_v3 = vld [vmem:[%s335_s30] sm:$0xf] }
  0x15   : > { %731 = vmatpush3.bf16.xpose.msra.mxu0 %v401_v2  ;;  %v722_v17 = vld [vmem:[%s632_s10 + $0x40] sm:$0xf] }
  0x16   : > { %v481_v18 = vsel %vm479_vm3, %v722_v17, 0  ;;  %v467_v33 = vld [vmem:[#allocation4] sm:$0xff] }
  0x17   : > { %v443_v13 = vld [vmem:[#allocation2] sm:$0xff]  ;;  %737 = vmatpush3.bf16.msra.mxu1 %v481_v18  ;;  %v459_v27 = vld [vmem:[#allocation3] sm:$0xff] }
  0x1c   : > { %733 = vmatmul.mubr.msk.bf16.vlgmr.msra.gmra.mxu0 %vm385_vm0, %v387_v3 }
  0xdc   : > { %v437_v6 = vpop.f32.mrf.mxu0 }
  0xdd   : > { %v438_v7 = vadd.f32 %v720_v5, %v437_v6 }
  0xde   : > { %v734_v8 = vpop.f32.mrf.mxu0 }
  0xdf   : > { %v444_v9 = vsel %vm385_vm0, %v438_v7, -inf }
  0xe0   : > { %445 = vmax.xlane.f32.xlu0 %v444_v9  ;;  %v440_v10 = vpop.f32.mrf.mxu0 }
  0xe2   : > { %v735_v11 = vpop.f32.mrf.mxu0 }
 0x169   : > { %v446_v14 = vpop.xlane.xlu0 %445 }
 0x16a   : > { %v447_v15 = vmax.f32 %v443_v13, %v446_v14 }
 0x16c   : > { %v448_v16 = vsub.f32 %v443_v13, %v447_v15  ;;  %525 = vst.msk [vmem:[#allocation2] sm:$0xff] %vm382_vm2, %v447_v15  ;;  %453 = vperm.xlu0 %786, %v447_v15  }
 0x16e   : > { %v449_v23 = vmul.f32 1.442695, %v448_v16 }
 0x1e7   : > { %v454_v19 = vpop.permute.xlu0 %453 }
 0x1e8   : > { %v456_v20 = vsub.f32 %v438_v7, %v454_v19 }
 0x1ea   : > { %v457_v21 = vmul.f32 1.442695, %v456_v20 }
 0x1ec   : > { %788 = vpow2.f32 %v457_v21 }
 0x1ed   : > { %790 = vpow2.f32 %v449_v23 }
 0x1f9   : > { %v789_v22 = vpop.eup %788 }
 0x1fa   : > { %v461_v24 = vsel %vm385_vm0, %v789_v22, 0.0  ;;  %v474_v25 = vpack.c.bf16 %v789_v22, %v789_v22  ;;  %v791_v26 = vpop.eup %790 }
 0x1fb   : > { %462 = vadd.xlane.f32.xlu1 %v461_v24  ;;  %v460_v28 = vmul.f32 %v791_v26, %v459_v27 }
 0x1fc   : > { %739 = vmatmul.mubr.msk.bf16.vlgmr.msra.gmra.mxu1 %vm385_vm0, %v474_v25 }
 0x20c   : > { %470 = vperm.xlu1 %787, %v791_v26  }
 0x284   : > { %v463_v29 = vpop.xlane.xlu1 %462 }
 0x285   : > { %v464_v30 = vadd.f32 %v463_v29, %v460_v28 }
 0x287   : > { %466 = vst.msk [vmem:[#allocation3] sm:$0xff] %vm382_vm2, %v464_v30 }
 0x288   : > { %v471_v34 = vpop.permute.xlu1 %470 }
 0x289   : > { %v473_v35 = vmul.f32 %v471_v34, %v467_v33 }
 0x28e   : > { %v530_v31 = vld [vmem:[#allocation3] sm:$0xff] }
 0x28f   : > { %792 = vrcp.f32 %v530_v31 }
 0x29c   : > { %v793_v32 = vpop.eup %792 }
 0x29d   : > { %534 = vperm.xlu1 %787, %v793_v32  }
 0x2bc   : > { %v517_v36 = vpop.f32.mrf.mxu1 }
 0x2bd   : > { %v523_v37 = vadd.f32 %v517_v36, %v473_v35 }
 0x2be   : > { %v740_v38 = vpop.f32.mrf.mxu1 }
 0x2bf   : > { %524 = vst.msk [vmem:[#allocation4] sm:$0xff] %vm385_vm0, %v523_v37 }
 0x2c0   : > { %v520_v39 = vpop.f32.mrf.mxu1 }
 0x2c2   : > { %v741_v40 = vpop.f32.mrf.mxu1 }
 0x2c6   : > { %v529_v41 = vld [vmem:[#allocation4] sm:$0xff] }
 0x318   : > { %v535_v42 = vpop.permute.xlu1 %534 }
 0x319   : > { %v537_v43 = vmul.f32 %v535_v42, %v529_v41 }
 0x31b   : > { %v538_v44 = vpack.c.bf16 %v537_v43, %v537_v43 }
 0x31d   : > { %540 = vst.msk [vmem:[%s376_s13] sm:$0xf] %vm539_vm4, %v538_v44 }
 0x31e PF: > { %s14_s19 = sadd.s32 1, %s832_s19   ;;  %s945_s15 = smov %s824_s17 }
 0x31f   : > { %p11_p7 = scmp.ge.s32.totalorder %s14_s19, 10   ;;  %s946_s16 = smov %s828_s18 }
 0x320   : > { %s947_s17 = smov %s950_s20  ;;  %s948_s18 = smov %s954_s21 }
 0x321   :  { %13 = sbr.rel (!%p11_p7) target bundleno = 3 (0x3), region = 83 }

// kernel: transformer_forward.38
= control target key start
LH: loop header
LB: loop body
LE: loop exit
PB: predicated region body
PF: predicated region fallthrough
CT: control target
= control target key end

     0   :  { %s856_s15 = smov 0   ;;  %s858_s16 = smov 0   ;;  %s933_s0 = inlined_call_operand.vmem [shape: bf16[1,2,4,8,8], index: 0, kind: input, shape index: {}]   ;;  %s934_s1 = inlined_call_operand.vmem [shape: bf16[2,2,4,8,8], index: 1, kind: input, shape index: {}, may-alias: {1,2}]   ;;  %s935_s2 = inlined_call_operand.vmem [shape: bf16[2,2,4,8,8], index: 2, kind: input, shape index: {}, may-alias: {1,2}]   ;;  %s936_s3 = inlined_call_operand.vmem [shape: f32[2,1,8], index: 3, kind: input, shape index: {}]   ;;  %s937_s4 = inlined_call_operand.vmem [shape: bf16[2,4,8,8], index: 4, kind: output, shape index: {}]  }
   0x1   :  { %s860_s17 = smov 0   ;;  %s862_s18 = smov 0  }
   0x2   :  { %s864_s19 = smov 0  }
   0x3 LB: > { %s36_s20 = sadd.s32 1, %s817_s17  ;;  %s40_s21 = sadd.s32 1, %s821_s18  ;;  %s825_s19 = sphi %s864_s19, %s14_s19   ;;  %s821_s18 = sphi %s862_s18, %s941_s18   ;;  %s817_s17 = sphi %s860_s17, %s940_s17   ;;  %s813_s16 = sphi %s858_s16, %s939_s16   ;;  %s809_s15 = sphi %s856_s15, %s938_s15  }
   0x4   : > { %p38_p0 = scmp.ge.s32.totalorder %s36_s20, 4  ;;  %p704_p1 = scmp.ge.s32.totalorder %s825_s19, 1 }
   0x5   : > { %p256_p2 = scmp.lt.s32.totalorder %s825_s19, 9 }
   0x6   : > { %s943_s20 = smov (%p38_p0, %s36_s20), 0  ;;  %s945_s21 = smov (!%p38_p0, %s40_s21), %s821_s18 }
   0x7   : > { %p257_p3 = pnand %p704_p1, %p256_p2  ;;  %p42_p4 = scmp.ge.s32.totalorder %s945_s21, 2 }
   0x8   : > { %p323_p5 = scmp.lt.s32.totalorder (!%p257_p3), %s813_s16, 1  ;;  %p325_p6 = scmp.lt.s32.totalorder (!%p257_p3), %s809_s15, 3 }
   0x9   : > { %s947_s21 = smov (%p42_p4, %s945_s21), 0  ;;  %260 = sbr.rel (%p257_p3) target bundleno = 798 (0x31e), region = 36 }
   0xe   : > { %vm382_vm0 = vcmask 64512   ;;  %v827_v0 = vmov 0.0   ;;  %vm828_vm1 = vmmov 0   ;;  %s949_s16 = smov (!%p323_p5, %s813_s16), 1  ;;  %s951_s15 = smov (!%p325_p6, %s809_s15), 3  ;;  %vm379_vm2 = vcmask 7168  }
   0xf   : > { %723 = vmatprep.subr.bf16.mxu0 %v827_v0  ;;  %383 = vst.msk [vmem:[#allocation4] sm:$0xff] %vm382_vm0, %v827_v0  ;;  %725 = vmatprep.mubr.msk.bf16.mxu0 %vm828_vm1, %v827_v0  ;;  %s705_s22 = sshll.u32 %s949_s16, 2  ;;  %v829_v4 = vmov -1e+30   ;;  %s362_s7 = scalar_lea.vmem %s936_s3, %s949_s16  ;;  %v830_v12 = vmov 0   ;;  %vm476_vm3 = vcmask 1043456  }
  0x10   : > { %729 = vmatprep.subr.bf16.mxu1 %v827_v0  ;;  %731 = vmatprep.mubr.msk.bf16.mxu1 %vm828_vm1, %v827_v0  ;;  %s331_s23 = sadd.s32 %s705_s22, %s951_s15  ;;  %380 = vst.msk [vmem:[#allocation2] sm:$0xff] %vm379_vm2, %v829_v4  ;;  %381 = vst.msk [vmem:[#allocation3] sm:$0xff] %vm379_vm2, %v827_v0  ;;  %v713_v5 = vld [vmem:[%s362_s7] ss:$0 sm:$0xff]  ;;  %vm536_vm4 = vcmask 60416  }
  0x11   : > { %s887_s24 = sshll.u32 %s331_s23, 2  ;;  %779 = vset.pattern.permute.xlu0 %v830_v12  ;;  %780 = vset.pattern.permute.xlu1 %v830_v12 }
  0x12   : > { %s344_s27 = scalar_lea.vmem %s934_s1, %s887_s24  ;;  %s333_s30 = scalar_lea.vmem %s933_s0, %s887_s24 }
  0x13   : > { %v385_v1 = vld [vmem:[%s344_s27] sm:$0xf]  ;;  %s626_s10 = scalar_lea.vmem %s935_s2, %s887_s24  ;;  %s373_s13 = scalar_lea.vmem %s937_s4, %s887_s24 }
  0x14   : > { %v398_v2 = vsel %vm382_vm0, %v385_v1, 0  ;;  %v384_v3 = vld [vmem:[%s333_s30] sm:$0xf] }
  0x15   : > { %724 = vmatpush3.bf16.xpose.msra.mxu0 %v398_v2  ;;  %v715_v17 = vld [vmem:[%s626_s10 + $0x20] sm:$0xf] }
  0x16   : > { %v478_v18 = vsel %vm476_vm3, %v715_v17, 0  ;;  %v464_v33 = vld [vmem:[#allocation4] sm:$0xff] }
  0x17   : > { %v440_v13 = vld [vmem:[#allocation2] sm:$0xff]  ;;  %730 = vmatpush3.bf16.msra.mxu1 %v478_v18  ;;  %v456_v27 = vld [vmem:[#allocation3] sm:$0xff] }
  0x1c   : > { %726 = vmatmul.mubr.msk.bf16.vlgmr.msra.gmra.mxu0 %vm382_vm0, %v384_v3 }
  0xdc   : > { %v434_v6 = vpop.f32.mrf.mxu0 }
  0xdd   : > { %v435_v7 = vadd.f32 %v713_v5, %v434_v6 }
  0xde   : > { %v727_v8 = vpop.f32.mrf.mxu0 }
  0xdf   : > { %v441_v9 = vsel %vm382_vm0, %v435_v7, -inf }
  0xe0   : > { %442 = vmax.xlane.f32.xlu0 %v441_v9  ;;  %v437_v10 = vpop.f32.mrf.mxu0 }
  0xe2   : > { %v728_v11 = vpop.f32.mrf.mxu0 }
 0x169   : > { %v443_v14 = vpop.xlane.xlu0 %442 }
 0x16a   : > { %v444_v15 = vmax.f32 %v440_v13, %v443_v14 }
 0x16c   : > { %v445_v16 = vsub.f32 %v440_v13, %v444_v15  ;;  %522 = vst.msk [vmem:[#allocation2] sm:$0xff] %vm379_vm2, %v444_v15  ;;  %450 = vperm.xlu0 %779, %v444_v15  }
 0x16e   : > { %v446_v23 = vmul.f32 1.442695, %v445_v16 }
 0x1e7   : > { %v451_v19 = vpop.permute.xlu0 %450 }
 0x1e8   : > { %v453_v20 = vsub.f32 %v435_v7, %v451_v19 }
 0x1ea   : > { %v454_v21 = vmul.f32 1.442695, %v453_v20 }
 0x1ec   : > { %781 = vpow2.f32 %v454_v21 }
 0x1ed   : > { %783 = vpow2.f32 %v446_v23 }
 0x1f9   : > { %v782_v22 = vpop.eup %781 }
 0x1fa   : > { %v458_v24 = vsel %vm382_vm0, %v782_v22, 0.0  ;;  %v471_v25 = vpack.c.bf16 %v782_v22, %v782_v22  ;;  %v784_v26 = vpop.eup %783 }
 0x1fb   : > { %459 = vadd.xlane.f32.xlu1 %v458_v24  ;;  %v457_v28 = vmul.f32 %v784_v26, %v456_v27 }
 0x1fc   : > { %732 = vmatmul.mubr.msk.bf16.vlgmr.msra.gmra.mxu1 %vm382_vm0, %v471_v25 }
 0x20c   : > { %467 = vperm.xlu1 %780, %v784_v26  }
 0x284   : > { %v460_v29 = vpop.xlane.xlu1 %459 }
 0x285   : > { %v461_v30 = vadd.f32 %v460_v29, %v457_v28 }
 0x287   : > { %463 = vst.msk [vmem:[#allocation3] sm:$0xff] %vm379_vm2, %v461_v30 }
 0x288   : > { %v468_v34 = vpop.permute.xlu1 %467 }
 0x289   : > { %v470_v35 = vmul.f32 %v468_v34, %v464_v33 }
 0x28e   : > { %v527_v31 = vld [vmem:[#allocation3] sm:$0xff] }
 0x28f   : > { %785 = vrcp.f32 %v527_v31 }
 0x29c   : > { %v786_v32 = vpop.eup %785 }
 0x29d   : > { %531 = vperm.xlu1 %780, %v786_v32  }
 0x2bc   : > { %v514_v36 = vpop.f32.mrf.mxu1 }
 0x2bd   : > { %v520_v37 = vadd.f32 %v514_v36, %v470_v35 }
 0x2be   : > { %v733_v38 = vpop.f32.mrf.mxu1 }
 0x2bf   : > { %521 = vst.msk [vmem:[#allocation4] sm:$0xff] %vm382_vm0, %v520_v37 }
 0x2c0   : > { %v517_v39 = vpop.f32.mrf.mxu1 }
 0x2c2   : > { %v734_v40 = vpop.f32.mrf.mxu1 }
 0x2c6   : > { %v526_v41 = vld [vmem:[#allocation4] sm:$0xff] }
 0x318   : > { %v532_v42 = vpop.permute.xlu1 %531 }
 0x319   : > { %v534_v43 = vmul.f32 %v532_v42, %v526_v41 }
 0x31b   : > { %v535_v44 = vpack.c.bf16 %v534_v43, %v534_v43 }
 0x31d   : > { %537 = vst.msk [vmem:[%s373_s13] sm:$0xf] %vm536_vm4, %v535_v44 }
 0x31e PF: > { %s14_s19 = sadd.s32 1, %s825_s19   ;;  %s938_s15 = smov %s817_s17 }
 0x31f   : > { %p11_p7 = scmp.ge.s32.totalorder %s14_s19, 10   ;;  %s939_s16 = smov %s821_s18 }
 0x320   : > { %s940_s17 = smov %s943_s20  ;;  %s941_s18 = smov %s947_s21 }
 0x321   :  { %13 = sbr.rel (!%p11_p7) target bundleno = 3 (0x3), region = 83 }

// kernel: transformer_forward.49
= control target key start
LH: loop header
LB: loop body
LE: loop exit
PB: predicated region body
PF: predicated region fallthrough
CT: control target
= control target key end

     0   :  { %v123_v0 = vmov 0.0   ;;  %vm124_vm0 = vmmov 0   ;;  %vm43_vm1 = vcmask 261120   ;;  %s155_s1 = inlined_call_operand.vmem [shape: bf16[32,128], index: 1, kind: input, shape index: {}]   ;;  %s156_s0 = inlined_call_operand.vmem [shape: bf16[16,32], index: 0, kind: input, shape index: {}]   ;;  %s157_s2 = inlined_call_operand.vmem [shape: f32[16,128], index: 2, kind: output, shape index: {}]  }
   0x1   :  { %110 = vmatprep.subr.bf16.mxu0 %v123_v0  ;;  %v120_v1 = vld [vmem:[%s155_s1 + $0x8] sm:$0xff]   ;;  %114 = vmatprep.mubr.msk.bf16.mxu0 %vm124_vm0, %v123_v0  ;;  %v121_v2 = vld [vmem:[%s155_s1] sm:$0xff]  }
   0x2   :  { %111 = vmatpush3.bf16.msra.mxu0 %v120_v1  ;;  %v122_v3 = vld [vmem:[%s156_s0] sm:$0xff]  }
   0x3   :  { %112 = vmatprep.subr.bf16.mxu0 %v123_v0 }
   0x6   :  { %113 = vmatpush3.bf16.msra.mxu0 %v121_v2 }
   0x9   :  { %115 = vmatmul.mubr.msk.bf16.vlgmr.msra.gmra.mxu0 %vm43_vm1, %v122_v3 }
  0xc9   :  { %v81_v4 = vpop.f32.mrf.mxu0 }
  0xca   :  { %97 = vst [vmem:[%s157_s2] sm:$0xff] %v81_v4 }
  0xcb   :  { %v116_v5 = vpop.f32.mrf.mxu0 }
  0xcd   :  { %v84_v6 = vpop.f32.mrf.mxu0 }
  0xce   :  { %98 = vst [vmem:[%s157_s2 + $0x8] sm:$0xff] %v84_v6 }
  0xcf   :  { %v117_v7 = vpop.f32.mrf.mxu0 }

</bundles_post_ra>
